<compile_context>
chip_gen: v6e
topology: v6e:2x2x1
jax: 0.10.0
libtpu: 0.0.40
codegen_flags: <defaults>
</compile_context>

<pallas_src>
import numpy as np
import jax
import jax.numpy as jnp
from jax import lax
from jax.experimental import pallas as pl
from jax.experimental.pallas import tpu as pltpu

_HI = lax.Precision.HIGHEST  # only used by the pure-JAX reference

# LeNet geometry (pinned by fc1 expecting 16*4*4 features): 28x28x1 input, 5x5 convs.
_K = 5
_H1, _C1 = 28, 6
_HO1 = _H1 - _K + 1          # 24  conv1 output H/W
_HP1 = _HO1 // 2             # 12  after 2x2 pool
_C2 = 16
_HO2 = _HP1 - _K + 1         # 8   conv2 output H/W
_HP2 = _HO2 // 2             # 4   after 2x2 pool
_FC1, _FC2, _FC3 = 120, 84, 10
_OUT_PAD = 128               # padded output lanes (dense store), sliced to 10 outside


def net_kernel(x_ref, t1_ref, b1c_ref, t2_ref, b2c_ref,
               w1p_ref, b1f_ref, w2f_ref, b2f_ref, w3f_ref, b3f_ref, o_ref):
    """Whole LeNet forward for the full batch, everything resident in VMEM.

    x_ref  : (28*N, 28)   input rows ordered (h%4, h//4, n)
    t1_ref : (5, 28, 144) conv1 banded weights, lanes = (wo%2)*72 + (wo//2)*6 + c
    t2_ref : (5, 72, 128) conv2 banded weights, rows = wp*6+ci, lanes = (wo2%2)*64 + (wo2//2)*16 + c2
    w1p_ref: (4, 64, 120) fc1 weights permuted to (q, wp2*16 + c2) (torch flatten folded in)
    o_ref  : (N, 128)     fc3 output padded to 128 lanes
    """
    f32 = jnp.float32
    N = o_ref.shape[0]

    xv = x_ref[...]                     # (28N, 28)
    t1 = t1_ref[...]                    # (5, 28, 144)
    t2 = t2_ref[...]                    # (5, 72, 128)
    b1c = b1c_ref[...]                  # (1, 144)
    b2c = b2c_ref[...]                  # (1, 128)

    # ---- conv1: output rows h1 = 4j + r, one accumulator per residue r ------------
    # Each tap is a single batched MXU matmul over a contiguous row slice of xv.
    def conv1_res(r):
        acc = jnp.zeros((6 * N, _HO1 * _C1), f32)
        for ki in range(_K):
            s = r + ki
            a, b4 = s // 4, s % 4
            lhs = xv[(b4 * 7 + a) * N:(b4 * 7 + a + 6) * N, :]          # (6N, 28)
            acc = acc + jnp.dot(lhs, t1[ki], preferred_element_type=f32)
        return acc

    # H-pool (pairs h1 = 2m, 2m+1) is a pure max between residue accumulators.
    pe = jnp.maximum(jnp.maximum(conv1_res(0), conv1_res(1)) + b1c, 0.0)  # m even
    po = jnp.maximum(jnp.maximum(conv1_res(2), conv1_res(3)) + b1c, 0.0)  # m odd
    # W-pool: lanes ordered (wo parity, wo//2, c) -> single lane-half max, dense.
    p1 = (jnp.maximum(pe[:, :72], pe[:, 72:]),     # rows j*N+n  (m = 2j)
          jnp.maximum(po[:, :72], po[:, 72:]))     # rows j*N+n  (m = 2j+1); lanes wp*6+ci

    # ---- conv2: output rows ho2 = 2q + par, one accumulator per parity ------------
    def conv2_par(par):
        acc = jnp.zeros((4 * N, _HO2 * _C2), f32)
        for ki in range(_K):
            s = ki + par
            a, b2 = s // 2, s % 2
            lhs = p1[b2][a * N:(a + 4) * N, :]                           # (4N, 72)
            acc = acc + jnp.dot(lhs, t2[ki], preferred_element_type=f32)
        return acc

    h2 = jnp.maximum(jnp.maximum(conv2_par(0), conv2_par(1)) + b2c, 0.0)  # (4N, 128)
    p2 = jnp.maximum(h2[:, :64], h2[:, 64:])        # (4N, 64): rows q*N+n, lanes wp2*16+c2

    # ---- fc1 (torch flatten folded into w1p) -> ReLU -> fc2 -> ReLU -> fc3 --------
    w1p = w1p_ref[...]                              # (4, 64, 120)
    acc = jnp.zeros((N, _FC1), f32)
    for q in range(_HP2):
        acc = acc + jnp.dot(p2[q * N:(q + 1) * N, :], w1p[q],
                            preferred_element_type=f32)
    h = jnp.maximum(acc + b1f_ref[...], 0.0)
    h = jnp.maximum(jnp.dot(h, w2f_ref[...], preferred_element_type=f32)
                    + b2f_ref[...], 0.0)
    o_ref[...] = jnp.dot(h, w3f_ref[...], preferred_element_type=f32) + b3f_ref[...]


def prepare_params(p):
    """One-time host-side weight preprocessing (banded conv weights, permutations)."""
    f32 = np.float32
    w1 = np.asarray(p["conv1_w"], f32)
    b1 = np.asarray(p["conv1_b"], f32)
    w2 = np.asarray(p["conv2_w"], f32)
    b2 = np.asarray(p["conv2_b"], f32)

    # conv1 banded weights: t1[ki, w_in, lane], lane = (wo%2)*72 + (wo//2)*6 + c
    wo = np.arange(_HO1)
    win = np.arange(_H1)
    kj = win[:, None] - wo[None, :]                              # (28, 24)
    valid = ((kj >= 0) & (kj < _K)).astype(f32)
    kj_c = np.clip(kj, 0, _K - 1)
    w1_k = np.transpose(w1[:, 0], (1, 2, 0))                     # (ki, kj, c)
    t1 = w1_k[:, kj_c, :] * valid[None, :, :, None]              # (5, 28, 24, 6)
    t1 = t1.reshape(_K, _H1, _HP1, 2, _C1).transpose(0, 1, 3, 2, 4)
    t1 = t1.reshape(_K, _H1, _HO1 * _C1)
    b1c = np.tile(b1, _HO1).reshape(1, _HO1 * _C1)

    # conv2 banded weights: t2[ki, wp*6+ci, lane], lane = (wo2%2)*64 + (wo2//2)*16 + c2
    wo2 = np.arange(_HO2)
    wp = np.arange(_HP1)
    kj2 = wp[:, None] - wo2[None, :]                             # (12, 8)
    valid2 = ((kj2 >= 0) & (kj2 < _K)).astype(f32)
    kj2_c = np.clip(kj2, 0, _K - 1)
    w2_k = np.transpose(w2, (2, 3, 1, 0))                        # (ki, kj, ci, co)
    t2 = w2_k[:, kj2_c, :, :] * valid2[None, :, :, None, None]   # (5, 12, 8, 6, 16)
    t2 = t2.transpose(0, 1, 3, 2, 4)                             # (ki, wp, ci, wo2, c2)
    t2 = t2.reshape(_K, _HP1, _C1, _HP2, 2, _C2).transpose(0, 1, 2, 4, 3, 5)
    t2 = t2.reshape(_K, _HP1 * _C1, _HO2 * _C2)
    b2c = np.tile(b2, _HO2).reshape(1, _HO2 * _C2)

    # fc1 permuted so the kernel's (q, wp2*16 + c2) layout matches torch's
    # x.view(-1, 16*4*4) flatten of the (C, H, W) conv output.
    w1p = np.asarray(p["fc1_w"], f32).reshape(_FC1, _C2, _HP2, _HP2)
    w1p = w1p.transpose(2, 3, 1, 0).reshape(_HP2, _HP2 * _C2, _FC1)

    # fc3 padded to 128 output lanes for a dense final store.
    w3p = np.zeros((_FC2, _OUT_PAD), f32)
    w3p[:, :_FC3] = np.asarray(p["fc3_w"], f32).T
    b3p = np.zeros((1, _OUT_PAD), f32)
    b3p[0, :_FC3] = np.asarray(p["fc3_b"], f32)

    return dict(
        t1=jnp.asarray(t1), b1c=jnp.asarray(b1c),
        t2=jnp.asarray(t2), b2c=jnp.asarray(b2c),
        w1p=jnp.asarray(w1p),
        b1f=jnp.asarray(np.asarray(p["fc1_b"], f32).reshape(1, -1)),
        w2f=jnp.asarray(np.asarray(p["fc2_w"], f32).T),
        b2f=jnp.asarray(np.asarray(p["fc2_b"], f32).reshape(1, -1)),
        w3f=jnp.asarray(w3p), b3f=jnp.asarray(b3p))


def net_forward(x_nchw, w):
    """Pallas forward. x_nchw: (N, 1, 28, 28) float32 (PyTorch layout)."""
    N = x_nchw.shape[0]
    # Rows ordered (h%4, h//4, n) so each conv tap reads one contiguous row slice.
    x = x_nchw[:, 0, :, :]                              # (N, 28, 28), Cin = 1
    x = jnp.transpose(x, (1, 0, 2))                     # (28, N, 28)  [h, n, w]
    x = x.reshape(7, 4, N, _H1).transpose(1, 0, 2, 3).reshape(4 * 7 * N, _H1)

    out = pl.pallas_call(
        net_kernel,
        out_shape=jax.ShapeDtypeStruct((N, _OUT_PAD), jnp.float32),
        in_specs=[pl.BlockSpec(memory_space=pltpu.MemorySpace.VMEM)] * 11,
        out_specs=pl.BlockSpec(memory_space=pltpu.MemorySpace.VMEM),
    )(x, w["t1"], w["b1c"], w["t2"], w["b2c"],
      w["w1p"], w["b1f"], w["w2f"], w["b2f"], w["w3f"], w["b3f"])
    return out[:, :_FC3]


def reference_forward(x, p):
    """Pure-JAX reference with PyTorch semantics (NCHW, OIHW)."""
    def conv(v, w, b):
        y = lax.conv_general_dilated(v, w, (1, 1), "VALID",
                                     dimension_numbers=("NCHW", "OIHW", "NCHW"),
                                     precision=_HI)
        return y + b[None, :, None, None]

    def pool(v):
        return lax.reduce_window(v, -jnp.inf, lax.max, (1, 1, 2, 2), (1, 1, 2, 2), "VALID")

    y = pool(jnp.maximum(conv(x, p["conv1_w"], p["conv1_b"]), 0.0))
    y = pool(jnp.maximum(conv(y, p["conv2_w"], p["conv2_b"]), 0.0))
    y = y.reshape(x.shape[0], -1)
    y = jnp.maximum(jnp.dot(y, p["fc1_w"].T, precision=_HI) + p["fc1_b"], 0.0)
    y = jnp.maximum(jnp.dot(y, p["fc2_w"].T, precision=_HI) + p["fc2_b"], 0.0)
    return jnp.dot(y, p["fc3_w"].T, precision=_HI) + p["fc3_b"]


if __name__ == "__main__":
    key = jax.random.PRNGKey(0)
    ks = jax.random.split(key, 11)

    def uinit(k, shape, fan_in):
        bound = 1.0 / float(np.sqrt(fan_in))
        return jax.random.uniform(k, shape, jnp.float32, -bound, bound)

    # Deterministic synthetic parameters in PyTorch-convention shapes.
    params = {
        "conv1_w": uinit(ks[0], (6, 1, 5, 5), 1 * 5 * 5),
        "conv1_b": uinit(ks[1], (6,), 1 * 5 * 5),
        "conv2_w": uinit(ks[2], (16, 6, 5, 5), 6 * 5 * 5),
        "conv2_b": uinit(ks[3], (16,), 6 * 5 * 5),
        "fc1_w": uinit(ks[4], (120, 256), 256),
        "fc1_b": uinit(ks[5], (120,), 256),
        "fc2_w": uinit(ks[6], (84, 120), 120),
        "fc2_b": uinit(ks[7], (84,), 120),
        "fc3_w": uinit(ks[8], (10, 84), 84),
        "fc3_b": uinit(ks[9], (10,), 84),
    }

    # MNIST-shaped input (the FC sizes require 28x28x1); small batch of 4.
    x = jax.random.normal(ks[10], (4, 1, 28, 28), jnp.float32)

    prepped = prepare_params(params)            # one-time, outside the jitted forward
    fwd = jax.jit(net_forward)
    out = jax.block_until_ready(fwd(x, prepped))
    assert out.shape == (4, 10), out.shape

    # Loose tolerance: kernel uses default MXU precision, reference uses f32 HIGHEST.
    ref = reference_forward(x, params)
    if not np.allclose(np.asarray(out), np.asarray(ref), atol=5e-2, rtol=5e-2):
        err = float(np.max(np.abs(np.asarray(out) - np.asarray(ref))))
        raise SystemExit(f"mismatch vs reference, max abs err = {err}")
    print("KERNEL_OK")
</pallas_src>

<mosaic_0001>
module attributes {stable_mosaic.version = 11 : i64} {
  func.func @net_kernel(%arg0: memref<112x28xf32, #tpu.memory_space<vmem>>, %arg1: memref<5x28x144xf32, #tpu.memory_space<vmem>>, %arg2: memref<1x144xf32, #tpu.memory_space<vmem>>, %arg3: memref<5x72x128xf32, #tpu.memory_space<vmem>>, %arg4: memref<1x128xf32, #tpu.memory_space<vmem>>, %arg5: memref<4x64x120xf32, #tpu.memory_space<vmem>>, %arg6: memref<1x120xf32, #tpu.memory_space<vmem>>, %arg7: memref<120x84xf32, #tpu.memory_space<vmem>>, %arg8: memref<1x84xf32, #tpu.memory_space<vmem>>, %arg9: memref<84x128xf32, #tpu.memory_space<vmem>>, %arg10: memref<1x128xf32, #tpu.memory_space<vmem>>, %arg11: memref<4x128xf32, #tpu.memory_space<vmem>>) attributes {dimension_semantics = [], scalar_prefetch = 0 : i64, scratch_operands = 0 : i64, tpu.core_type = #tpu.core_type<tc>} {
    %c0 = arith.constant 0 : index
    %c0_0 = arith.constant 0 : index
    %0 = vector.load %arg0[%c0, %c0_0] : memref<112x28xf32, #tpu.memory_space<vmem>>, vector<112x28xf32>
    %c0_1 = arith.constant 0 : index
    %c0_2 = arith.constant 0 : index
    %c0_3 = arith.constant 0 : index
    %1 = vector.load %arg1[%c0_1, %c0_2, %c0_3] : memref<5x28x144xf32, #tpu.memory_space<vmem>>, vector<5x28x144xf32>
    %c0_4 = arith.constant 0 : index
    %c0_5 = arith.constant 0 : index
    %c0_6 = arith.constant 0 : index
    %2 = vector.load %arg3[%c0_4, %c0_5, %c0_6] : memref<5x72x128xf32, #tpu.memory_space<vmem>>, vector<5x72x128xf32>
    %c0_7 = arith.constant 0 : index
    %c0_8 = arith.constant 0 : index
    %3 = vector.load %arg2[%c0_7, %c0_8] : memref<1x144xf32, #tpu.memory_space<vmem>>, vector<1x144xf32>
    %c0_9 = arith.constant 0 : index
    %c0_10 = arith.constant 0 : index
    %4 = vector.load %arg4[%c0_9, %c0_10] : memref<1x128xf32, #tpu.memory_space<vmem>>, vector<1x128xf32>
    %cst = arith.constant 0.000000e+00 : f32
    %5 = vector.broadcast %cst : f32 to vector<24x144xf32>
    %6 = vector.extract_strided_slice %0 {offsets = [0, 0], sizes = [24, 28], strides = [1, 1]} : vector<112x28xf32> to vector<24x28xf32>
    %7 = vector.extract_strided_slice %1 {offsets = [0, 0, 0], sizes = [1, 28, 144], strides = [1, 1, 1]} : vector<5x28x144xf32> to vector<1x28x144xf32>
    %8 = vector.shape_cast %7 : vector<1x28x144xf32> to vector<28x144xf32>
    %cst_11 = arith.constant dense<0.000000e+00> : vector<24x144xf32>
    %9 = tpu.matmul %6, %8, %cst_11 {dimension_numbers = #tpu.dot_dimension_numbers<[1], [0], [0], [1], [0, 0, 1, 1], [], []>} : vector<24x28xf32>, vector<28x144xf32>, vector<24x144xf32> -> vector<24x144xf32>
    %10 = arith.addf %5, %9 : vector<24x144xf32>
    %11 = vector.extract_strided_slice %0 {offsets = [28, 0], sizes = [24, 28], strides = [1, 1]} : vector<112x28xf32> to vector<24x28xf32>
    %12 = vector.extract_strided_slice %1 {offsets = [1, 0, 0], sizes = [1, 28, 144], strides = [1, 1, 1]} : vector<5x28x144xf32> to vector<1x28x144xf32>
    %13 = vector.shape_cast %12 : vector<1x28x144xf32> to vector<28x144xf32>
    %cst_12 = arith.constant dense<0.000000e+00> : vector<24x144xf32>
    %14 = tpu.matmul %11, %13, %cst_12 {dimension_numbers = #tpu.dot_dimension_numbers<[1], [0], [0], [1], [0, 0, 1, 1], [], []>} : vector<24x28xf32>, vector<28x144xf32>, vector<24x144xf32> -> vector<24x144xf32>
    %15 = arith.addf %10, %14 : vector<24x144xf32>
    %16 = vector.extract_strided_slice %0 {offsets = [56, 0], sizes = [24, 28], strides = [1, 1]} : vector<112x28xf32> to vector<24x28xf32>
    %17 = vector.extract_strided_slice %1 {offsets = [2, 0, 0], sizes = [1, 28, 144], strides = [1, 1, 1]} : vector<5x28x144xf32> to vector<1x28x144xf32>
    %18 = vector.shape_cast %17 : vector<1x28x144xf32> to vector<28x144xf32>
    %cst_13 = arith.constant dense<0.000000e+00> : vector<24x144xf32>
    %19 = tpu.matmul %16, %18, %cst_13 {dimension_numbers = #tpu.dot_dimension_numbers<[1], [0], [0], [1], [0, 0, 1, 1], [], []>} : vector<24x28xf32>, vector<28x144xf32>, vector<24x144xf32> -> vector<24x144xf32>
    %20 = arith.addf %15, %19 : vector<24x144xf32>
    %21 = vector.extract_strided_slice %0 {offsets = [84, 0], sizes = [24, 28], strides = [1, 1]} : vector<112x28xf32> to vector<24x28xf32>
    %22 = vector.extract_strided_slice %1 {offsets = [3, 0, 0], sizes = [1, 28, 144], strides = [1, 1, 1]} : vector<5x28x144xf32> to vector<1x28x144xf32>
    %23 = vector.shape_cast %22 : vector<1x28x144xf32> to vector<28x144xf32>
    %cst_14 = arith.constant dense<0.000000e+00> : vector<24x144xf32>
    %24 = tpu.matmul %21, %23, %cst_14 {dimension_numbers = #tpu.dot_dimension_numbers<[1], [0], [0], [1], [0, 0, 1, 1], [], []>} : vector<24x28xf32>, vector<28x144xf32>, vector<24x144xf32> -> vector<24x144xf32>
    %25 = arith.addf %20, %24 : vector<24x144xf32>
    %26 = vector.extract_strided_slice %0 {offsets = [4, 0], sizes = [24, 28], strides = [1, 1]} : vector<112x28xf32> to vector<24x28xf32>
    %27 = vector.extract_strided_slice %1 {offsets = [4, 0, 0], sizes = [1, 28, 144], strides = [1, 1, 1]} : vector<5x28x144xf32> to vector<1x28x144xf32>
    %28 = vector.shape_cast %27 : vector<1x28x144xf32> to vector<28x144xf32>
    %cst_15 = arith.constant dense<0.000000e+00> : vector<24x144xf32>
    %29 = tpu.matmul %26, %28, %cst_15 {dimension_numbers = #tpu.dot_dimension_numbers<[1], [0], [0], [1], [0, 0, 1, 1], [], []>} : vector<24x28xf32>, vector<28x144xf32>, vector<24x144xf32> -> vector<24x144xf32>
    %30 = arith.addf %25, %29 : vector<24x144xf32>
    %cst_16 = arith.constant 0.000000e+00 : f32
    %31 = vector.broadcast %cst_16 : f32 to vector<24x144xf32>
    %32 = vector.extract_strided_slice %0 {offsets = [28, 0], sizes = [24, 28], strides = [1, 1]} : vector<112x28xf32> to vector<24x28xf32>
    %33 = vector.extract_strided_slice %1 {offsets = [0, 0, 0], sizes = [1, 28, 144], strides = [1, 1, 1]} : vector<5x28x144xf32> to vector<1x28x144xf32>
    %34 = vector.shape_cast %33 : vector<1x28x144xf32> to vector<28x144xf32>
    %cst_17 = arith.constant dense<0.000000e+00> : vector<24x144xf32>
    %35 = tpu.matmul %32, %34, %cst_17 {dimension_numbers = #tpu.dot_dimension_numbers<[1], [0], [0], [1], [0, 0, 1, 1], [], []>} : vector<24x28xf32>, vector<28x144xf32>, vector<24x144xf32> -> vector<24x144xf32>
    %36 = arith.addf %31, %35 : vector<24x144xf32>
    %37 = vector.extract_strided_slice %0 {offsets = [56, 0], sizes = [24, 28], strides = [1, 1]} : vector<112x28xf32> to vector<24x28xf32>
    %38 = vector.extract_strided_slice %1 {offsets = [1, 0, 0], sizes = [1, 28, 144], strides = [1, 1, 1]} : vector<5x28x144xf32> to vector<1x28x144xf32>
    %39 = vector.shape_cast %38 : vector<1x28x144xf32> to vector<28x144xf32>
    %cst_18 = arith.constant dense<0.000000e+00> : vector<24x144xf32>
    %40 = tpu.matmul %37, %39, %cst_18 {dimension_numbers = #tpu.dot_dimension_numbers<[1], [0], [0], [1], [0, 0, 1, 1], [], []>} : vector<24x28xf32>, vector<28x144xf32>, vector<24x144xf32> -> vector<24x144xf32>
    %41 = arith.addf %36, %40 : vector<24x144xf32>
    %42 = vector.extract_strided_slice %0 {offsets = [84, 0], sizes = [24, 28], strides = [1, 1]} : vector<112x28xf32> to vector<24x28xf32>
    %43 = vector.extract_strided_slice %1 {offsets = [2, 0, 0], sizes = [1, 28, 144], strides = [1, 1, 1]} : vector<5x28x144xf32> to vector<1x28x144xf32>
    %44 = vector.shape_cast %43 : vector<1x28x144xf32> to vector<28x144xf32>
    %cst_19 = arith.constant dense<0.000000e+00> : vector<24x144xf32>
    %45 = tpu.matmul %42, %44, %cst_19 {dimension_numbers = #tpu.dot_dimension_numbers<[1], [0], [0], [1], [0, 0, 1, 1], [], []>} : vector<24x28xf32>, vector<28x144xf32>, vector<24x144xf32> -> vector<24x144xf32>
    %46 = arith.addf %41, %45 : vector<24x144xf32>
    %47 = vector.extract_strided_slice %0 {offsets = [4, 0], sizes = [24, 28], strides = [1, 1]} : vector<112x28xf32> to vector<24x28xf32>
    %48 = vector.extract_strided_slice %1 {offsets = [3, 0, 0], sizes = [1, 28, 144], strides = [1, 1, 1]} : vector<5x28x144xf32> to vector<1x28x144xf32>
    %49 = vector.shape_cast %48 : vector<1x28x144xf32> to vector<28x144xf32>
    %cst_20 = arith.constant dense<0.000000e+00> : vector<24x144xf32>
    %50 = tpu.matmul %47, %49, %cst_20 {dimension_numbers = #tpu.dot_dimension_numbers<[1], [0], [0], [1], [0, 0, 1, 1], [], []>} : vector<24x28xf32>, vector<28x144xf32>, vector<24x144xf32> -> vector<24x144xf32>
    %51 = arith.addf %46, %50 : vector<24x144xf32>
    %52 = vector.extract_strided_slice %0 {offsets = [32, 0], sizes = [24, 28], strides = [1, 1]} : vector<112x28xf32> to vector<24x28xf32>
    %53 = vector.extract_strided_slice %1 {offsets = [4, 0, 0], sizes = [1, 28, 144], strides = [1, 1, 1]} : vector<5x28x144xf32> to vector<1x28x144xf32>
    %54 = vector.shape_cast %53 : vector<1x28x144xf32> to vector<28x144xf32>
    %cst_21 = arith.constant dense<0.000000e+00> : vector<24x144xf32>
    %55 = tpu.matmul %52, %54, %cst_21 {dimension_numbers = #tpu.dot_dimension_numbers<[1], [0], [0], [1], [0, 0, 1, 1], [], []>} : vector<24x28xf32>, vector<28x144xf32>, vector<24x144xf32> -> vector<24x144xf32>
    %56 = arith.addf %51, %55 : vector<24x144xf32>
    %57 = arith.maximumf %30, %56 : vector<24x144xf32>
    %58 = vector.broadcast %3 : vector<1x144xf32> to vector<24x144xf32>
    %59 = arith.addf %57, %58 : vector<24x144xf32>
    %cst_22 = arith.constant 0.000000e+00 : f32
    %60 = vector.broadcast %cst_22 : f32 to vector<24x144xf32>
    %61 = arith.maximumf %59, %60 : vector<24x144xf32>
    %cst_23 = arith.constant 0.000000e+00 : f32
    %62 = vector.broadcast %cst_23 : f32 to vector<24x144xf32>
    %63 = vector.extract_strided_slice %0 {offsets = [56, 0], sizes = [24, 28], strides = [1, 1]} : vector<112x28xf32> to vector<24x28xf32>
    %64 = vector.extract_strided_slice %1 {offsets = [0, 0, 0], sizes = [1, 28, 144], strides = [1, 1, 1]} : vector<5x28x144xf32> to vector<1x28x144xf32>
    %65 = vector.shape_cast %64 : vector<1x28x144xf32> to vector<28x144xf32>
    %cst_24 = arith.constant dense<0.000000e+00> : vector<24x144xf32>
    %66 = tpu.matmul %63, %65, %cst_24 {dimension_numbers = #tpu.dot_dimension_numbers<[1], [0], [0], [1], [0, 0, 1, 1], [], []>} : vector<24x28xf32>, vector<28x144xf32>, vector<24x144xf32> -> vector<24x144xf32>
    %67 = arith.addf %62, %66 : vector<24x144xf32>
    %68 = vector.extract_strided_slice %0 {offsets = [84, 0], sizes = [24, 28], strides = [1, 1]} : vector<112x28xf32> to vector<24x28xf32>
    %69 = vector.extract_strided_slice %1 {offsets = [1, 0, 0], sizes = [1, 28, 144], strides = [1, 1, 1]} : vector<5x28x144xf32> to vector<1x28x144xf32>
    %70 = vector.shape_cast %69 : vector<1x28x144xf32> to vector<28x144xf32>
    %cst_25 = arith.constant dense<0.000000e+00> : vector<24x144xf32>
    %71 = tpu.matmul %68, %70, %cst_25 {dimension_numbers = #tpu.dot_dimension_numbers<[1], [0], [0], [1], [0, 0, 1, 1], [], []>} : vector<24x28xf32>, vector<28x144xf32>, vector<24x144xf32> -> vector<24x144xf32>
    %72 = arith.addf %67, %71 : vector<24x144xf32>
    %73 = vector.extract_strided_slice %0 {offsets = [4, 0], sizes = [24, 28], strides = [1, 1]} : vector<112x28xf32> to vector<24x28xf32>
    %74 = vector.extract_strided_slice %1 {offsets = [2, 0, 0], sizes = [1, 28, 144], strides = [1, 1, 1]} : vector<5x28x144xf32> to vector<1x28x144xf32>
    %75 = vector.shape_cast %74 : vector<1x28x144xf32> to vector<28x144xf32>
    %cst_26 = arith.constant dense<0.000000e+00> : vector<24x144xf32>
    %76 = tpu.matmul %73, %75, %cst_26 {dimension_numbers = #tpu.dot_dimension_numbers<[1], [0], [0], [1], [0, 0, 1, 1], [], []>} : vector<24x28xf32>, vector<28x144xf32>, vector<24x144xf32> -> vector<24x144xf32>
    %77 = arith.addf %72, %76 : vector<24x144xf32>
    %78 = vector.extract_strided_slice %0 {offsets = [32, 0], sizes = [24, 28], strides = [1, 1]} : vector<112x28xf32> to vector<24x28xf32>
    %79 = vector.extract_strided_slice %1 {offsets = [3, 0, 0], sizes = [1, 28, 144], strides = [1, 1, 1]} : vector<5x28x144xf32> to vector<1x28x144xf32>
    %80 = vector.shape_cast %79 : vector<1x28x144xf32> to vector<28x144xf32>
    %cst_27 = arith.constant dense<0.000000e+00> : vector<24x144xf32>
    %81 = tpu.matmul %78, %80, %cst_27 {dimension_numbers = #tpu.dot_dimension_numbers<[1], [0], [0], [1], [0, 0, 1, 1], [], []>} : vector<24x28xf32>, vector<28x144xf32>, vector<24x144xf32> -> vector<24x144xf32>
    %82 = arith.addf %77, %81 : vector<24x144xf32>
    %83 = vector.extract_strided_slice %0 {offsets = [60, 0], sizes = [24, 28], strides = [1, 1]} : vector<112x28xf32> to vector<24x28xf32>
    %84 = vector.extract_strided_slice %1 {offsets = [4, 0, 0], sizes = [1, 28, 144], strides = [1, 1, 1]} : vector<5x28x144xf32> to vector<1x28x144xf32>
    %85 = vector.shape_cast %84 : vector<1x28x144xf32> to vector<28x144xf32>
    %cst_28 = arith.constant dense<0.000000e+00> : vector<24x144xf32>
    %86 = tpu.matmul %83, %85, %cst_28 {dimension_numbers = #tpu.dot_dimension_numbers<[1], [0], [0], [1], [0, 0, 1, 1], [], []>} : vector<24x28xf32>, vector<28x144xf32>, vector<24x144xf32> -> vector<24x144xf32>
    %87 = arith.addf %82, %86 : vector<24x144xf32>
    %cst_29 = arith.constant 0.000000e+00 : f32
    %88 = vector.broadcast %cst_29 : f32 to vector<24x144xf32>
    %89 = vector.extract_strided_slice %0 {offsets = [84, 0], sizes = [24, 28], strides = [1, 1]} : vector<112x28xf32> to vector<24x28xf32>
    %90 = vector.extract_strided_slice %1 {offsets = [0, 0, 0], sizes = [1, 28, 144], strides = [1, 1, 1]} : vector<5x28x144xf32> to vector<1x28x144xf32>
    %91 = vector.shape_cast %90 : vector<1x28x144xf32> to vector<28x144xf32>
    %cst_30 = arith.constant dense<0.000000e+00> : vector<24x144xf32>
    %92 = tpu.matmul %89, %91, %cst_30 {dimension_numbers = #tpu.dot_dimension_numbers<[1], [0], [0], [1], [0, 0, 1, 1], [], []>} : vector<24x28xf32>, vector<28x144xf32>, vector<24x144xf32> -> vector<24x144xf32>
    %93 = arith.addf %88, %92 : vector<24x144xf32>
    %94 = vector.extract_strided_slice %0 {offsets = [4, 0], sizes = [24, 28], strides = [1, 1]} : vector<112x28xf32> to vector<24x28xf32>
    %95 = vector.extract_strided_slice %1 {offsets = [1, 0, 0], sizes = [1, 28, 144], strides = [1, 1, 1]} : vector<5x28x144xf32> to vector<1x28x144xf32>
    %96 = vector.shape_cast %95 : vector<1x28x144xf32> to vector<28x144xf32>
    %cst_31 = arith.constant dense<0.000000e+00> : vector<24x144xf32>
    %97 = tpu.matmul %94, %96, %cst_31 {dimension_numbers = #tpu.dot_dimension_numbers<[1], [0], [0], [1], [0, 0, 1, 1], [], []>} : vector<24x28xf32>, vector<28x144xf32>, vector<24x144xf32> -> vector<24x144xf32>
    %98 = arith.addf %93, %97 : vector<24x144xf32>
    %99 = vector.extract_strided_slice %0 {offsets = [32, 0], sizes = [24, 28], strides = [1, 1]} : vector<112x28xf32> to vector<24x28xf32>
    %100 = vector.extract_strided_slice %1 {offsets = [2, 0, 0], sizes = [1, 28, 144], strides = [1, 1, 1]} : vector<5x28x144xf32> to vector<1x28x144xf32>
    %101 = vector.shape_cast %100 : vector<1x28x144xf32> to vector<28x144xf32>
    %cst_32 = arith.constant dense<0.000000e+00> : vector<24x144xf32>
    %102 = tpu.matmul %99, %101, %cst_32 {dimension_numbers = #tpu.dot_dimension_numbers<[1], [0], [0], [1], [0, 0, 1, 1], [], []>} : vector<24x28xf32>, vector<28x144xf32>, vector<24x144xf32> -> vector<24x144xf32>
    %103 = arith.addf %98, %102 : vector<24x144xf32>
    %104 = vector.extract_strided_slice %0 {offsets = [60, 0], sizes = [24, 28], strides = [1, 1]} : vector<112x28xf32> to vector<24x28xf32>
    %105 = vector.extract_strided_slice %1 {offsets = [3, 0, 0], sizes = [1, 28, 144], strides = [1, 1, 1]} : vector<5x28x144xf32> to vector<1x28x144xf32>
    %106 = vector.shape_cast %105 : vector<1x28x144xf32> to vector<28x144xf32>
    %cst_33 = arith.constant dense<0.000000e+00> : vector<24x144xf32>
    %107 = tpu.matmul %104, %106, %cst_33 {dimension_numbers = #tpu.dot_dimension_numbers<[1], [0], [0], [1], [0, 0, 1, 1], [], []>} : vector<24x28xf32>, vector<28x144xf32>, vector<24x144xf32> -> vector<24x144xf32>
    %108 = arith.addf %103, %107 : vector<24x144xf32>
    %109 = vector.extract_strided_slice %0 {offsets = [88, 0], sizes = [24, 28], strides = [1, 1]} : vector<112x28xf32> to vector<24x28xf32>
    %110 = vector.extract_strided_slice %1 {offsets = [4, 0, 0], sizes = [1, 28, 144], strides = [1, 1, 1]} : vector<5x28x144xf32> to vector<1x28x144xf32>
    %111 = vector.shape_cast %110 : vector<1x28x144xf32> to vector<28x144xf32>
    %cst_34 = arith.constant dense<0.000000e+00> : vector<24x144xf32>
    %112 = tpu.matmul %109, %111, %cst_34 {dimension_numbers = #tpu.dot_dimension_numbers<[1], [0], [0], [1], [0, 0, 1, 1], [], []>} : vector<24x28xf32>, vector<28x144xf32>, vector<24x144xf32> -> vector<24x144xf32>
    %113 = arith.addf %108, %112 : vector<24x144xf32>
    %114 = arith.maximumf %87, %113 : vector<24x144xf32>
    %115 = vector.broadcast %3 : vector<1x144xf32> to vector<24x144xf32>
    %116 = arith.addf %114, %115 : vector<24x144xf32>
    %cst_35 = arith.constant 0.000000e+00 : f32
    %117 = vector.broadcast %cst_35 : f32 to vector<24x144xf32>
    %118 = arith.maximumf %116, %117 : vector<24x144xf32>
    %119 = vector.extract_strided_slice %61 {offsets = [0, 0], sizes = [24, 72], strides = [1, 1]} : vector<24x144xf32> to vector<24x72xf32>
    %120 = vector.extract_strided_slice %61 {offsets = [0, 72], sizes = [24, 72], strides = [1, 1]} : vector<24x144xf32> to vector<24x72xf32>
    %121 = arith.maximumf %119, %120 : vector<24x72xf32>
    %122 = vector.extract_strided_slice %118 {offsets = [0, 0], sizes = [24, 72], strides = [1, 1]} : vector<24x144xf32> to vector<24x72xf32>
    %123 = vector.extract_strided_slice %118 {offsets = [0, 72], sizes = [24, 72], strides = [1, 1]} : vector<24x144xf32> to vector<24x72xf32>
    %124 = arith.maximumf %122, %123 : vector<24x72xf32>
    %cst_36 = arith.constant 0.000000e+00 : f32
    %125 = vector.broadcast %cst_36 : f32 to vector<16x128xf32>
    %126 = vector.extract_strided_slice %121 {offsets = [0, 0], sizes = [16, 72], strides = [1, 1]} : vector<24x72xf32> to vector<16x72xf32>
    %127 = vector.extract_strided_slice %2 {offsets = [0, 0, 0], sizes = [1, 72, 128], strides = [1, 1, 1]} : vector<5x72x128xf32> to vector<1x72x128xf32>
    %128 = vector.shape_cast %127 : vector<1x72x128xf32> to vector<72x128xf32>
    %cst_37 = arith.constant dense<0.000000e+00> : vector<16x128xf32>
    %129 = tpu.matmul %126, %128, %cst_37 {dimension_numbers = #tpu.dot_dimension_numbers<[1], [0], [0], [1], [0, 0, 1, 1], [], []>} : vector<16x72xf32>, vector<72x128xf32>, vector<16x128xf32> -> vector<16x128xf32>
    %130 = arith.addf %125, %129 : vector<16x128xf32>
    %131 = vector.extract_strided_slice %124 {offsets = [0, 0], sizes = [16, 72], strides = [1, 1]} : vector<24x72xf32> to vector<16x72xf32>
    %132 = vector.extract_strided_slice %2 {offsets = [1, 0, 0], sizes = [1, 72, 128], strides = [1, 1, 1]} : vector<5x72x128xf32> to vector<1x72x128xf32>
    %133 = vector.shape_cast %132 : vector<1x72x128xf32> to vector<72x128xf32>
    %cst_38 = arith.constant dense<0.000000e+00> : vector<16x128xf32>
    %134 = tpu.matmul %131, %133, %cst_38 {dimension_numbers = #tpu.dot_dimension_numbers<[1], [0], [0], [1], [0, 0, 1, 1], [], []>} : vector<16x72xf32>, vector<72x128xf32>, vector<16x128xf32> -> vector<16x128xf32>
    %135 = arith.addf %130, %134 : vector<16x128xf32>
    %136 = vector.extract_strided_slice %121 {offsets = [4, 0], sizes = [16, 72], strides = [1, 1]} : vector<24x72xf32> to vector<16x72xf32>
    %137 = vector.extract_strided_slice %2 {offsets = [2, 0, 0], sizes = [1, 72, 128], strides = [1, 1, 1]} : vector<5x72x128xf32> to vector<1x72x128xf32>
    %138 = vector.shape_cast %137 : vector<1x72x128xf32> to vector<72x128xf32>
    %cst_39 = arith.constant dense<0.000000e+00> : vector<16x128xf32>
    %139 = tpu.matmul %136, %138, %cst_39 {dimension_numbers = #tpu.dot_dimension_numbers<[1], [0], [0], [1], [0, 0, 1, 1], [], []>} : vector<16x72xf32>, vector<72x128xf32>, vector<16x128xf32> -> vector<16x128xf32>
    %140 = arith.addf %135, %139 : vector<16x128xf32>
    %141 = vector.extract_strided_slice %124 {offsets = [4, 0], sizes = [16, 72], strides = [1, 1]} : vector<24x72xf32> to vector<16x72xf32>
    %142 = vector.extract_strided_slice %2 {offsets = [3, 0, 0], sizes = [1, 72, 128], strides = [1, 1, 1]} : vector<5x72x128xf32> to vector<1x72x128xf32>
    %143 = vector.shape_cast %142 : vector<1x72x128xf32> to vector<72x128xf32>
    %cst_40 = arith.constant dense<0.000000e+00> : vector<16x128xf32>
    %144 = tpu.matmul %141, %143, %cst_40 {dimension_numbers = #tpu.dot_dimension_numbers<[1], [0], [0], [1], [0, 0, 1, 1], [], []>} : vector<16x72xf32>, vector<72x128xf32>, vector<16x128xf32> -> vector<16x128xf32>
    %145 = arith.addf %140, %144 : vector<16x128xf32>
    %146 = vector.extract_strided_slice %121 {offsets = [8, 0], sizes = [16, 72], strides = [1, 1]} : vector<24x72xf32> to vector<16x72xf32>
    %147 = vector.extract_strided_slice %2 {offsets = [4, 0, 0], sizes = [1, 72, 128], strides = [1, 1, 1]} : vector<5x72x128xf32> to vector<1x72x128xf32>
    %148 = vector.shape_cast %147 : vector<1x72x128xf32> to vector<72x128xf32>
    %cst_41 = arith.constant dense<0.000000e+00> : vector<16x128xf32>
    %149 = tpu.matmul %146, %148, %cst_41 {dimension_numbers = #tpu.dot_dimension_numbers<[1], [0], [0], [1], [0, 0, 1, 1], [], []>} : vector<16x72xf32>, vector<72x128xf32>, vector<16x128xf32> -> vector<16x128xf32>
    %150 = arith.addf %145, %149 : vector<16x128xf32>
    %cst_42 = arith.constant 0.000000e+00 : f32
    %151 = vector.broadcast %cst_42 : f32 to vector<16x128xf32>
    %152 = vector.extract_strided_slice %124 {offsets = [0, 0], sizes = [16, 72], strides = [1, 1]} : vector<24x72xf32> to vector<16x72xf32>
    %153 = vector.extract_strided_slice %2 {offsets = [0, 0, 0], sizes = [1, 72, 128], strides = [1, 1, 1]} : vector<5x72x128xf32> to vector<1x72x128xf32>
    %154 = vector.shape_cast %153 : vector<1x72x128xf32> to vector<72x128xf32>
    %cst_43 = arith.constant dense<0.000000e+00> : vector<16x128xf32>
    %155 = tpu.matmul %152, %154, %cst_43 {dimension_numbers = #tpu.dot_dimension_numbers<[1], [0], [0], [1], [0, 0, 1, 1], [], []>} : vector<16x72xf32>, vector<72x128xf32>, vector<16x128xf32> -> vector<16x128xf32>
    %156 = arith.addf %151, %155 : vector<16x128xf32>
    %157 = vector.extract_strided_slice %121 {offsets = [4, 0], sizes = [16, 72], strides = [1, 1]} : vector<24x72xf32> to vector<16x72xf32>
    %158 = vector.extract_strided_slice %2 {offsets = [1, 0, 0], sizes = [1, 72, 128], strides = [1, 1, 1]} : vector<5x72x128xf32> to vector<1x72x128xf32>
    %159 = vector.shape_cast %158 : vector<1x72x128xf32> to vector<72x128xf32>
    %cst_44 = arith.constant dense<0.000000e+00> : vector<16x128xf32>
    %160 = tpu.matmul %157, %159, %cst_44 {dimension_numbers = #tpu.dot_dimension_numbers<[1], [0], [0], [1], [0, 0, 1, 1], [], []>} : vector<16x72xf32>, vector<72x128xf32>, vector<16x128xf32> -> vector<16x128xf32>
    %161 = arith.addf %156, %160 : vector<16x128xf32>
    %162 = vector.extract_strided_slice %124 {offsets = [4, 0], sizes = [16, 72], strides = [1, 1]} : vector<24x72xf32> to vector<16x72xf32>
    %163 = vector.extract_strided_slice %2 {offsets = [2, 0, 0], sizes = [1, 72, 128], strides = [1, 1, 1]} : vector<5x72x128xf32> to vector<1x72x128xf32>
    %164 = vector.shape_cast %163 : vector<1x72x128xf32> to vector<72x128xf32>
    %cst_45 = arith.constant dense<0.000000e+00> : vector<16x128xf32>
    %165 = tpu.matmul %162, %164, %cst_45 {dimension_numbers = #tpu.dot_dimension_numbers<[1], [0], [0], [1], [0, 0, 1, 1], [], []>} : vector<16x72xf32>, vector<72x128xf32>, vector<16x128xf32> -> vector<16x128xf32>
    %166 = arith.addf %161, %165 : vector<16x128xf32>
    %167 = vector.extract_strided_slice %121 {offsets = [8, 0], sizes = [16, 72], strides = [1, 1]} : vector<24x72xf32> to vector<16x72xf32>
    %168 = vector.extract_strided_slice %2 {offsets = [3, 0, 0], sizes = [1, 72, 128], strides = [1, 1, 1]} : vector<5x72x128xf32> to vector<1x72x128xf32>
    %169 = vector.shape_cast %168 : vector<1x72x128xf32> to vector<72x128xf32>
    %cst_46 = arith.constant dense<0.000000e+00> : vector<16x128xf32>
    %170 = tpu.matmul %167, %169, %cst_46 {dimension_numbers = #tpu.dot_dimension_numbers<[1], [0], [0], [1], [0, 0, 1, 1], [], []>} : vector<16x72xf32>, vector<72x128xf32>, vector<16x128xf32> -> vector<16x128xf32>
    %171 = arith.addf %166, %170 : vector<16x128xf32>
    %172 = vector.extract_strided_slice %124 {offsets = [8, 0], sizes = [16, 72], strides = [1, 1]} : vector<24x72xf32> to vector<16x72xf32>
    %173 = vector.extract_strided_slice %2 {offsets = [4, 0, 0], sizes = [1, 72, 128], strides = [1, 1, 1]} : vector<5x72x128xf32> to vector<1x72x128xf32>
    %174 = vector.shape_cast %173 : vector<1x72x128xf32> to vector<72x128xf32>
    %cst_47 = arith.constant dense<0.000000e+00> : vector<16x128xf32>
    %175 = tpu.matmul %172, %174, %cst_47 {dimension_numbers = #tpu.dot_dimension_numbers<[1], [0], [0], [1], [0, 0, 1, 1], [], []>} : vector<16x72xf32>, vector<72x128xf32>, vector<16x128xf32> -> vector<16x128xf32>
    %176 = arith.addf %171, %175 : vector<16x128xf32>
    %177 = arith.maximumf %150, %176 : vector<16x128xf32>
    %178 = vector.broadcast %4 : vector<1x128xf32> to vector<16x128xf32>
    %179 = arith.addf %177, %178 : vector<16x128xf32>
    %cst_48 = arith.constant 0.000000e+00 : f32
    %180 = vector.broadcast %cst_48 : f32 to vector<16x128xf32>
    %181 = arith.maximumf %179, %180 : vector<16x128xf32>
    %182 = vector.extract_strided_slice %181 {offsets = [0, 0], sizes = [16, 64], strides = [1, 1]} : vector<16x128xf32> to vector<16x64xf32>
    %183 = vector.extract_strided_slice %181 {offsets = [0, 64], sizes = [16, 64], strides = [1, 1]} : vector<16x128xf32> to vector<16x64xf32>
    %184 = arith.maximumf %182, %183 : vector<16x64xf32>
    %c0_49 = arith.constant 0 : index
    %c0_50 = arith.constant 0 : index
    %c0_51 = arith.constant 0 : index
    %185 = vector.load %arg5[%c0_49, %c0_50, %c0_51] : memref<4x64x120xf32, #tpu.memory_space<vmem>>, vector<4x64x120xf32>
    %cst_52 = arith.constant 0.000000e+00 : f32
    %186 = vector.broadcast %cst_52 : f32 to vector<4x120xf32>
    %187 = vector.extract_strided_slice %184 {offsets = [0, 0], sizes = [4, 64], strides = [1, 1]} : vector<16x64xf32> to vector<4x64xf32>
    %188 = vector.extract_strided_slice %185 {offsets = [0, 0, 0], sizes = [1, 64, 120], strides = [1, 1, 1]} : vector<4x64x120xf32> to vector<1x64x120xf32>
    %189 = vector.shape_cast %188 : vector<1x64x120xf32> to vector<64x120xf32>
    %cst_53 = arith.constant dense<0.000000e+00> : vector<4x120xf32>
    %190 = tpu.matmul %187, %189, %cst_53 {dimension_numbers = #tpu.dot_dimension_numbers<[1], [0], [0], [1], [0, 0, 1, 1], [], []>} : vector<4x64xf32>, vector<64x120xf32>, vector<4x120xf32> -> vector<4x120xf32>
    %191 = arith.addf %186, %190 : vector<4x120xf32>
    %192 = vector.extract_strided_slice %184 {offsets = [4, 0], sizes = [4, 64], strides = [1, 1]} : vector<16x64xf32> to vector<4x64xf32>
    %193 = vector.extract_strided_slice %185 {offsets = [1, 0, 0], sizes = [1, 64, 120], strides = [1, 1, 1]} : vector<4x64x120xf32> to vector<1x64x120xf32>
    %194 = vector.shape_cast %193 : vector<1x64x120xf32> to vector<64x120xf32>
    %cst_54 = arith.constant dense<0.000000e+00> : vector<4x120xf32>
    %195 = tpu.matmul %192, %194, %cst_54 {dimension_numbers = #tpu.dot_dimension_numbers<[1], [0], [0], [1], [0, 0, 1, 1], [], []>} : vector<4x64xf32>, vector<64x120xf32>, vector<4x120xf32> -> vector<4x120xf32>
    %196 = arith.addf %191, %195 : vector<4x120xf32>
    %197 = vector.extract_strided_slice %184 {offsets = [8, 0], sizes = [4, 64], strides = [1, 1]} : vector<16x64xf32> to vector<4x64xf32>
    %198 = vector.extract_strided_slice %185 {offsets = [2, 0, 0], sizes = [1, 64, 120], strides = [1, 1, 1]} : vector<4x64x120xf32> to vector<1x64x120xf32>
    %199 = vector.shape_cast %198 : vector<1x64x120xf32> to vector<64x120xf32>
    %cst_55 = arith.constant dense<0.000000e+00> : vector<4x120xf32>
    %200 = tpu.matmul %197, %199, %cst_55 {dimension_numbers = #tpu.dot_dimension_numbers<[1], [0], [0], [1], [0, 0, 1, 1], [], []>} : vector<4x64xf32>, vector<64x120xf32>, vector<4x120xf32> -> vector<4x120xf32>
    %201 = arith.addf %196, %200 : vector<4x120xf32>
    %202 = vector.extract_strided_slice %184 {offsets = [12, 0], sizes = [4, 64], strides = [1, 1]} : vector<16x64xf32> to vector<4x64xf32>
    %203 = vector.extract_strided_slice %185 {offsets = [3, 0, 0], sizes = [1, 64, 120], strides = [1, 1, 1]} : vector<4x64x120xf32> to vector<1x64x120xf32>
    %204 = vector.shape_cast %203 : vector<1x64x120xf32> to vector<64x120xf32>
    %cst_56 = arith.constant dense<0.000000e+00> : vector<4x120xf32>
    %205 = tpu.matmul %202, %204, %cst_56 {dimension_numbers = #tpu.dot_dimension_numbers<[1], [0], [0], [1], [0, 0, 1, 1], [], []>} : vector<4x64xf32>, vector<64x120xf32>, vector<4x120xf32> -> vector<4x120xf32>
    %206 = arith.addf %201, %205 : vector<4x120xf32>
    %c0_57 = arith.constant 0 : index
    %c0_58 = arith.constant 0 : index
    %207 = vector.load %arg6[%c0_57, %c0_58] : memref<1x120xf32, #tpu.memory_space<vmem>>, vector<1x120xf32>
    %208 = vector.broadcast %207 : vector<1x120xf32> to vector<4x120xf32>
    %209 = arith.addf %206, %208 : vector<4x120xf32>
    %cst_59 = arith.constant 0.000000e+00 : f32
    %210 = vector.broadcast %cst_59 : f32 to vector<4x120xf32>
    %211 = arith.maximumf %209, %210 : vector<4x120xf32>
    %c0_60 = arith.constant 0 : index
    %c0_61 = arith.constant 0 : index
    %212 = vector.load %arg7[%c0_60, %c0_61] : memref<120x84xf32, #tpu.memory_space<vmem>>, vector<120x84xf32>
    %cst_62 = arith.constant dense<0.000000e+00> : vector<4x84xf32>
    %213 = tpu.matmul %211, %212, %cst_62 {dimension_numbers = #tpu.dot_dimension_numbers<[1], [0], [0], [1], [0, 0, 1, 1], [], []>} : vector<4x120xf32>, vector<120x84xf32>, vector<4x84xf32> -> vector<4x84xf32>
    %c0_63 = arith.constant 0 : index
    %c0_64 = arith.constant 0 : index
    %214 = vector.load %arg8[%c0_63, %c0_64] : memref<1x84xf32, #tpu.memory_space<vmem>>, vector<1x84xf32>
    %215 = vector.broadcast %214 : vector<1x84xf32> to vector<4x84xf32>
    %216 = arith.addf %213, %215 : vector<4x84xf32>
    %cst_65 = arith.constant 0.000000e+00 : f32
    %217 = vector.broadcast %cst_65 : f32 to vector<4x84xf32>
    %218 = arith.maximumf %216, %217 : vector<4x84xf32>
    %c0_66 = arith.constant 0 : index
    %c0_67 = arith.constant 0 : index
    %219 = vector.load %arg9[%c0_66, %c0_67] : memref<84x128xf32, #tpu.memory_space<vmem>>, vector<84x128xf32>
    %cst_68 = arith.constant dense<0.000000e+00> : vector<4x128xf32>
    %220 = tpu.matmul %218, %219, %cst_68 {dimension_numbers = #tpu.dot_dimension_numbers<[1], [0], [0], [1], [0, 0, 1, 1], [], []>} : vector<4x84xf32>, vector<84x128xf32>, vector<4x128xf32> -> vector<4x128xf32>
    %c0_69 = arith.constant 0 : index
    %c0_70 = arith.constant 0 : index
    %221 = vector.load %arg10[%c0_69, %c0_70] : memref<1x128xf32, #tpu.memory_space<vmem>>, vector<1x128xf32>
    %222 = vector.broadcast %221 : vector<1x128xf32> to vector<4x128xf32>
    %223 = arith.addf %220, %222 : vector<4x128xf32>
    %c0_71 = arith.constant 0 : index
    %c0_72 = arith.constant 0 : index
    %224 = vector.load %arg11[%c0_71, %c0_72] : memref<4x128xf32, #tpu.memory_space<vmem>>, vector<4x128xf32>
    tpu.vector_store %arg11[%c0_71, %c0_72], %223 {strides = array<i32>} : memref<4x128xf32, #tpu.memory_space<vmem>>, vector<4x128xf32>,
    return
  }
}

</mosaic_0001>

<bundles_post_ra>
// kernel: net_forward.1
= control target key start
LH: loop header
LB: loop body
LE: loop exit
PB: predicated region body
PF: predicated region fallthrough
CT: control target
= control target key end

     0   :  { %16 = vsyncpa [#allocation3], 0  ;;  %s5746_s0 = inlined_call_operand.vmem [shape: f32[112,28], index: 0, kind: input, shape index: {}]   ;;  %s5747_s1 = inlined_call_operand.hbm [shape: f32[5,28,144], index: 1, kind: input, shape index: {}]   ;;  %s5748_s2 = inlined_call_operand.vmem [shape: f32[1,144], index: 2, kind: input, shape index: {}]   ;;  %s5749_s3 = inlined_call_operand.vmem [shape: f32[5,72,128], index: 3, kind: input, shape index: {}]   ;;  %s5750_s4 = inlined_call_operand.vmem [shape: f32[1,128], index: 4, kind: input, shape index: {}]   ;;  %s5751_s5 = inlined_call_operand.vmem [shape: f32[4,64,120], index: 5, kind: input, shape index: {}]   ;;  %s5752_s6 = inlined_call_operand.vmem [shape: f32[1,120], index: 6, kind: input, shape index: {}]   ;;  %s5753_s7 = inlined_call_operand.vmem [shape: f32[120,84], index: 7, kind: input, shape index: {}]   ;;  %s5754_s8 = inlined_call_operand.vmem [shape: f32[1,84], index: 8, kind: input, shape index: {}]   ;;  %s5755_s9 = inlined_call_operand.hbm [shape: f32[84,128], index: 9, kind: input, shape index: {}]   ;;  %s5756_s10 = inlined_call_operand.vmem [shape: f32[1,128], index: 10, kind: input, shape index: {}]   ;;  %s5757_s11 = inlined_call_operand.hbm [shape: f32[4,128], index: 11, kind: output, shape index: {}]  }
   0x1   :  { %17 = vsyncpa [#allocation6], 0 }
   0x2   :  { %18 = vsyncpa [#allocation4], 0  ;;  %s4214_s17 = smov [#allocation2]  }
   0x3   :  { %s26_s18 = sshll.u32 %s4214_s17, 4  ;;  %s27_s18 = int_to_ptr.vmem [resolvable:$true] %s26_s18 }
   0x4   :  { %s4156_s19 = scalar_lea.vmem %s27_s18, 5120  ;;  %p4161_p1 = scmp.lt.s32.totalorder %s27_s18, %s27_s18 }
   0x5   :  { %p4157_p0 = scmp.ne.s32.totalorder %s27_s18, %s4156_s19  ;;  %p4162_p2 = scmp.lt.s32.totalorder %s4156_s19, %s4156_s19 }
   0x7   :  { %p4163_p3 = por %p4162_p2, %p4161_p1 }
   0x9   :  { %p4164_p4 = pnand %p4163_p3, %p4157_p0 }
   0xb   :  { %4167 = shalt.err (!%p4164_p4)
}
   0xc   :  { %s4215_s20 = smov 256   ;;  %s4216_s21 = smov 16  }
   0xd   :  { %32 = dma.hbm_to_vmem [thread:$0]  %s5747_s1, 5120, %s27_s18, [#allocation3], %s4215_s20, %s4215_s20, %s4216_s21  }
   0xe   :  { %s4217_s24 = smov [#allocation5]  }
   0xf   :  { %s52_s25 = sshll.u32 %s4217_s24, 4  ;;  %s53_s25 = int_to_ptr.vmem [resolvable:$true] %s52_s25 }
  0x10   :  { %s4176_s26 = scalar_lea.vmem %s53_s25, 1408  ;;  %p4181_p6 = scmp.lt.s32.totalorder %s53_s25, %s53_s25 }
  0x11   :  { %p4177_p5 = scmp.ne.s32.totalorder %s53_s25, %s4176_s26  ;;  %p4182_p7 = scmp.lt.s32.totalorder %s4176_s26, %s4176_s26 }
  0x13   :  { %p4183_p8 = por %p4182_p7, %p4181_p6 }
  0x15   :  { %p4184_p9 = pnand %p4183_p8, %p4177_p5 }
  0x17   :  { %4187 = shalt.err (!%p4184_p9)
}
  0x18   :  { %s4218_s27 = smov 128   ;;  %s4219_s28 = smov 8  }
  0x19   :  { %58 = dma.hbm_to_vmem [thread:$0]  %s5755_s9, 1408, %s53_s25, [#allocation6], %s4218_s27, %s4218_s27, %s4219_s28  }
  0x1a   :  { %4208 = dma.done.wait [#allocation3], 5120  }
  0x1b   :  { %4209 = vsyncadd [#allocation3], 4294962176 }
  0x1c   :  { %4210 = dma.done.wait [#allocation6], 1408  }
  0x1d   :  { %4211 = vsyncadd [#allocation6], 4294965888  ;;  %v5761_v0 = vmov 0.0   ;;  %vm172_vm0 = vcmask 1043456   ;;  %v4293_v1 = vld [vmem:[#allocation2 + $0x78] sm:$0xf] }
  0x1e   :  { %257 = vmatprep.mubr.f32.mxu0 %v5761_v0  ;;  %355 = vmatprep.mubr.f32.mxu1 %v5761_v0  ;;  %v4295_v2 = vld [vmem:[#allocation2 + $0x38] sm:$0xf]  ;;  %v4297_v3 = vld [vmem:[#allocation2 + $0x70] sm:$0xf]  ;;  %v4305_v5 = vld [vmem:[#allocation2 + $0x68] sm:$0xff]  ;;  %vm180_vm1 = vcmask 228352  }
  0x1f   :  { %3488 = vmatprep.subr.msk.mxu0 %vm172_vm0, %v4293_v1  ;;  %3493 = vmatprep.subr.msk.mxu1 %vm172_vm0, %v4295_v2  ;;  %v4303_v4 = vld [vmem:[#allocation2 + $0x30] sm:$0xf]  ;;  %v4307_v6 = vld [vmem:[#allocation2 + $0x28] sm:$0xff]  ;;  %v4313_v7 = vld [vmem:[#allocation2 + $0x60] sm:$0xff]  ;;  %s4221_s29 = smov 56   ;;  %vm2085_vm2 = vcmask 457728  }
  0x20   :  { %3489 = vmatpush1.msk.msra.mxu0 %vm172_vm0, %v4297_v3  ;;  %3494 = vmatpush1.msk.msra.mxu1 %vm172_vm0, %v4303_v4  ;;  %v4315_v8 = vld [vmem:[#allocation2 + $0x20] sm:$0xff]  ;;  %v4317_v9 = vld [vmem:[#allocation2 + $0x58] sm:$0xff]  ;;  %v4323_v11 = vld [vmem:[#allocation2 + $0x50] sm:$0xff]  ;;  %vm2122_vm3 = vcmask 588800   ;;  %vm4222_vm4 = vmmov 0   ;;  %s4223_s25 = smov 64  }
  0x21   :  { %219 = vmatprep.subr.mxu0 %v4305_v5  ;;  %317 = vmatprep.subr.mxu1 %v4307_v6  ;;  %v4321_v10 = vld [vmem:[#allocation2 + $0x18] sm:$0xff]  ;;  %v4325_v12 = vld [vmem:[#allocation2 + $0x10] sm:$0xff]  ;;  %v4329_v13 = vld [vmem:[#allocation2 + $0x48] sm:$0xff]  ;;  %vm2977_vm5 = vcmask 523264   ;;  %vm3301_vm6 = vcmask 982016   ;;  %vm3394_vm7 = vcmask 687104  }
  0x22   :  { %220 = vmatpush1.msra.mxu0 %v4313_v7  ;;  %318 = vmatpush1.msra.mxu1 %v4315_v8  ;;  %v4331_v14 = vld [vmem:[#allocation2 + $0x8] sm:$0xff]  ;;  %v4333_v15 = vld [vmem:[#allocation2 + $0x40] sm:$0xff]  ;;  %v4342_v17 = vld [vmem:[%s5746_s0 + $0x18] sm:$0xff] }
  0x23   :  { %221 = vmatprep.subr.mxu0 %v4317_v9  ;;  %319 = vmatprep.subr.mxu1 %v4321_v10  ;;  %v4337_v16 = vld [vmem:[#allocation2] sm:$0xff]  ;;  %v5759_v19 = vrot.slane %v4342_v17, 4  ;;  %v4360_v22 = vld [vmem:[#allocation2 + $0xb8] sm:$0xf]  ;;  %v4367_v24 = vld [vmem:[%s5746_s0 + $0x28] sm:$0xff] }
  0x24   :  { %v4347_v18 = vld [vmem:[%s5746_s0 + $0x20] sm:$0xff]  ;;  %222 = vmatpush1.msra.mxu0 %v4323_v11  ;;  %320 = vmatpush1.msra.mxu1 %v4325_v12  ;;  %v4362_v23 = vld [vmem:[#allocation2 + $0xf8] sm:$0xf]  ;;  %v4376_v26 = vld [vmem:[#allocation2 + $0xb0] sm:$0xf]  ;;  %v176_v27 = vrot.slane %v4367_v24, 4 }
  0x25   :  { %v174_v20 = vrot.slane %v4347_v18, 4  ;;  %v4356_v21 = vld [vmem:[%s5746_s0] sm:$0xff]  ;;  %223 = vmatprep.subr.mxu0 %v4329_v13  ;;  %321 = vmatprep.subr.mxu1 %v4331_v14  ;;  %v4383_v28 = vld [vmem:[#allocation2 + $0xa8] sm:$0xff]  ;;  %v4389_v29 = vld [vmem:[#allocation2 + $0xf0] sm:$0xf] }
  0x26   :  { %224 = vmatpush1.msra.mxu0 %v4333_v15  ;;  %322 = vmatpush1.msra.mxu1 %v4337_v16  ;;  %v4397_v31 = vld [vmem:[%s5746_s0 + $0x30] sm:$0xff]  ;;  %v4405_v32 = vld [vmem:[%s5746_s0 + $0x8] sm:$0xff]  ;;  %v4407_v33 = vld [vmem:[#allocation2 + $0xa0] sm:$0xff] }
  0x27   :  { %v4374_v25 = vsel %vm172_vm0, %v5759_v19, %v174_v20  ;;  %3495 = vmatmul.mubr.msk.f32.vlgmr.msra.gmra.mxu1 %vm180_vm1, %v4356_v21  ;;  %3498 = vmatprep.subr.msk.mxu0 %vm172_vm0, %v4360_v22  ;;  %v4392_v30 = vsel %vm172_vm0, %v174_v20, %v176_v27  ;;  %v178_v34 = vrot.slane %v4397_v31, 4  ;;  %v4412_v35 = vld [vmem:[#allocation2 + $0xe8] sm:$0xff]  ;;  %v4414_v36 = vld [vmem:[#allocation2 + $0x98] sm:$0xff]  ;;  %v4420_v37 = vld [vmem:[#allocation2 + $0xe0] sm:$0xff] }
  0x28   :  { %3490 = vmatmul.mubr.msk.f32.vlgmr.msra.gmra.mxu0 %vm180_vm1, %v4374_v25  ;;  %3503 = vmatprep.subr.msk.mxu1 %vm172_vm0, %v4362_v23  ;;  %v4425_v38 = vld [vmem:[%s5746_s0 + $0x50] sm:$0xff]  ;;  %v4430_v39 = vld [vmem:[%s5746_s0 + $0x58] sm:$0xff]  ;;  %v4451_v44 = vld [vmem:[#allocation2 + $0x88] sm:$0xff] }
  0x29   :  { %3499 = vmatpush1.msk.msra.mxu0 %vm172_vm0, %v4376_v26  ;;  %263 = vmatprep.mubr.f32.mxu0 %v5761_v0  ;;  %v4435_v40 = vld [vmem:[#allocation2 + $0x90] sm:$0xff]  ;;  %v4440_v41 = vsel %vm172_vm0, %v176_v27, %v178_v34  ;;  %v4449_v43 = vld [vmem:[#allocation2 + $0xd8] sm:$0xff]  ;;  %v5758_v45 = vrot.slane %v4425_v38, 4  ;;  %v483_v46 = vrot.slane %v4430_v39, 4  ;;  %v4459_v48 = vld [vmem:[#allocation2 + $0x80] sm:$0xff] }
  0x2a   :  { %361 = vmatprep.mubr.f32.mxu1 %v5761_v0  ;;  %415 = vmatprep.subr.mxu0 %v4383_v28  ;;  %v4445_v42 = vld [vmem:[%s5746_s0 + $0x10] sm:$0xff]  ;;  %v4465_v49 = vld [vmem:[#allocation2 + $0xc8] sm:$0xff]  ;;  %v4470_v50 = vld [vmem:[%s5746_s0 + $0x60] sm:$0xff] }
  0x2b   :  { %3504 = vmatpush1.msk.msra.mxu1 %vm172_vm0, %v4389_v29  ;;  %416 = vmatpush1.msra.mxu0 %v4407_v33  ;;  %v4457_v47 = vld [vmem:[#allocation2 + $0xd0] sm:$0xff]  ;;  %v4474_v51 = vld [vmem:[#allocation2 + $0xc0] sm:$0xff]  ;;  %v4481_v52 = vld [vmem:[%s5746_s0 + $0x38] sm:$0xff]  ;;  %v4486_v53 = vsel %vm172_vm0, %v5758_v45, %v483_v46  ;;  %v485_v55 = vrot.slane %v4470_v50, 4  ;;  %v591_v45 = vrot.slane %v4405_v32, 4 }
  0x2c   :  { %3491 = vmatmul.mubr.msk.f32.gmra.mxu0 %vm180_vm1, %v4392_v30  ;;  %3496 = vmatmul.mubr.msk.f32.gmra.mxu1 %vm180_vm1, %v4405_v32  ;;  %v4490_v54 = vld [vmem:[#allocation2 + $0x138] sm:$0xf]  ;;  %v4495_v56 = vld [vmem:[#allocation2 + $0x130] sm:$0xf]  ;;  %v4500_v57 = vld [vmem:[%s5746_s0 + $0x68] sm:$0xff] }
  0x2d   :  { %527 = vmatprep.subr.mxu1 %v4412_v35  ;;  %417 = vmatprep.subr.mxu0 %v4414_v36  ;;  %5777 = vst [vmem:[#allocation11_spill] sm:$0xff] %v4500_v57  ;;  %v4506_v58 = vld [vmem:[#allocation2 + $0x128] sm:$0xff]  ;;  %v4515_v59 = vld [vmem:[%s5746_s0 + $0x40] sm:$0xff]  ;;  %v4521_v60 = vsel %vm172_vm0, %v483_v46, %v485_v55  ;;  %v487_v62 = vrot.slane %v4500_v57, 4  ;;  %v4528_v63 = vld [vmem:[#allocation2 + $0x118] sm:$0xff]  ;;  %v590_v46 = vrot.slane %v4356_v21, 4 }
  0x2e   :  { %528 = vmatpush1.msra.mxu1 %v4420_v37  ;;  %269 = vmatprep.mubr.f32.mxu0 %v5761_v0  ;;  %v4523_v61 = vld [vmem:[#allocation2 + $0x120] sm:$0xff]  ;;  %v4537_v20 = vld [vmem:[#allocation2 + $0x110] sm:$0xff]  ;;  %v4544_v27 = vld [vmem:[%s5746_s0 + $0x48] sm:$0xff]  ;;  %v593_v21 = vrot.slane %v4445_v42, 4 }
  0x2f   :  { %367 = vmatprep.mubr.f32.mxu1 %v5761_v0  ;;  %418 = vmatpush1.msra.mxu0 %v4435_v40  ;;  %v4547_v34 = vsel %vm172_vm0, %v485_v55, %v487_v62  ;;  %v4553_v19 = vld [vmem:[#allocation2 + $0x108] sm:$0xff]  ;;  %v4557_v57 = vld [vmem:[#allocation2 + $0x100] sm:$0xff]  ;;  %v4569_v32 = vsel %vm172_vm0, %v590_v46, %v591_v45 }
  0x30   :  { %3492 = vmatmul.mubr.msk.f32.gmra.mxu0 %vm180_vm1, %v4440_v41  ;;  %3497 = vmatmul.mubr.msk.f32.gmra.mxu1 %vm180_vm1, %v4445_v42  ;;  %v4584_v42 = vsel %vm172_vm0, %v591_v45, %v593_v21  ;;  %v5778_v45 = vrot.slane %v4342_v17, 4  ;;  %v1509_v17 = vrot.slane %v4481_v52, 4 }
  0x31   :  { %529 = vmatprep.subr.mxu1 %v4449_v43  ;;  %419 = vmatprep.subr.mxu0 %v4451_v44 }
  0x32   :  { %530 = vmatpush1.msra.mxu1 %v4457_v47  ;;  %420 = vmatpush1.msra.mxu0 %v4459_v48  ;;  %v4603_v55 = vsel %vm172_vm0, %v593_v21, %v5778_v45 }
  0x33   :  { %531 = vmatprep.subr.mxu1 %v4465_v49  ;;  %453 = vmatprep.mubr.f32.mxu0 %v5761_v0 }
  0x34   :  { %532 = vmatpush1.msra.mxu1 %v4474_v51  ;;  %565 = vmatprep.mubr.f32.mxu1 %v5761_v0 }
  0x35   :  { %3500 = vmatmul.mubr.msk.f32.vlgmr.msra.gmra.mxu0 %vm180_vm1, %v4481_v52  ;;  %3505 = vmatmul.mubr.msk.f32.vlgmr.msra.gmra.mxu1 %vm180_vm1, %v4486_v53 }
  0x36   :  { %3508 = vmatprep.subr.msk.mxu0 %vm172_vm0, %v4490_v54  ;;  %3513 = vmatprep.subr.msk.mxu1 %vm172_vm0, %v4293_v1 }
  0x37   :  { %3509 = vmatpush1.msk.msra.mxu0 %vm172_vm0, %v4495_v56  ;;  %459 = vmatprep.mubr.f32.mxu0 %v5761_v0 }
  0x38   :  { %571 = vmatprep.mubr.f32.mxu1 %v5761_v0  ;;  %634 = vmatprep.subr.mxu0 %v4506_v58 }
  0x39   :  { %3514 = vmatpush1.msk.msra.mxu1 %vm172_vm0, %v4297_v3  ;;  %3501 = vmatmul.mubr.msk.f32.gmra.mxu0 %vm180_vm1, %v4515_v59 }
  0x3a   :  { %3506 = vmatmul.mubr.msk.f32.gmra.mxu1 %vm180_vm1, %v4521_v60  ;;  %635 = vmatpush1.msra.mxu0 %v4523_v61 }
  0x3b   :  { %723 = vmatprep.subr.mxu1 %v4305_v5  ;;  %636 = vmatprep.subr.mxu0 %v4528_v63 }
  0x3c   :  { %724 = vmatpush1.msra.mxu1 %v4313_v7  ;;  %465 = vmatprep.mubr.f32.mxu0 %v5761_v0 }
  0x3d   :  { %577 = vmatprep.mubr.f32.mxu1 %v5761_v0  ;;  %637 = vmatpush1.msra.mxu0 %v4537_v20 }
  0x3e   :  { %3502 = vmatmul.mubr.msk.f32.gmra.mxu0 %vm180_vm1, %v4544_v27  ;;  %3507 = vmatmul.mubr.msk.f32.gmra.mxu1 %vm180_vm1, %v4547_v34 }
  0x3f   :  { %725 = vmatprep.subr.mxu1 %v4317_v9  ;;  %638 = vmatprep.subr.mxu0 %v4553_v19 }
  0x40   :  { %726 = vmatpush1.msra.mxu1 %v4323_v11  ;;  %639 = vmatpush1.msra.mxu0 %v4557_v57 }
  0x41   :  { %727 = vmatprep.subr.mxu1 %v4329_v13  ;;  %672 = vmatprep.mubr.f32.mxu0 %v5761_v0 }
  0x42   :  { %728 = vmatpush1.msra.mxu1 %v4333_v15  ;;  %761 = vmatprep.mubr.f32.mxu1 %v5761_v0 }
  0x43   :  { %3510 = vmatmul.mubr.msk.f32.vlgmr.msra.gmra.mxu0 %vm180_vm1, %v4569_v32  ;;  %3515 = vmatmul.mubr.msk.f32.vlgmr.msra.gmra.mxu1 %vm180_vm1, %v4481_v52 }
  0x44   :  { %3518 = vmatprep.subr.msk.mxu0 %vm172_vm0, %v4295_v2  ;;  %3523 = vmatprep.subr.msk.mxu1 %vm172_vm0, %v4360_v22 }
  0x45   :  { %3519 = vmatpush1.msk.msra.mxu0 %vm172_vm0, %v4303_v4  ;;  %678 = vmatprep.mubr.f32.mxu0 %v5761_v0 }
  0x46   :  { %767 = vmatprep.mubr.f32.mxu1 %v5761_v0  ;;  %806 = vmatprep.subr.mxu0 %v4307_v6 }
  0x47   :  { %3524 = vmatpush1.msk.msra.mxu1 %vm172_vm0, %v4376_v26  ;;  %3511 = vmatmul.mubr.msk.f32.gmra.mxu0 %vm180_vm1, %v4584_v42 }
  0x48   :  { %3516 = vmatmul.mubr.msk.f32.gmra.mxu1 %vm180_vm1, %v4515_v59  ;;  %807 = vmatpush1.msra.mxu0 %v4315_v8 }
  0x49   :  { %889 = vmatprep.subr.mxu1 %v4383_v28  ;;  %808 = vmatprep.subr.mxu0 %v4321_v10 }
  0x4a   :  { %890 = vmatpush1.msra.mxu1 %v4407_v33  ;;  %684 = vmatprep.mubr.f32.mxu0 %v5761_v0 }
  0x4b   :  { %773 = vmatprep.mubr.f32.mxu1 %v5761_v0  ;;  %809 = vmatpush1.msra.mxu0 %v4325_v12 }
  0x4c   :  { %3512 = vmatmul.mubr.msk.f32.gmra.mxu0 %vm180_vm1, %v4603_v55  ;;  %3517 = vmatmul.mubr.msk.f32.gmra.mxu1 %vm180_vm1, %v4544_v27 }
  0x4d   :  { %891 = vmatprep.subr.mxu1 %v4414_v36  ;;  %810 = vmatprep.subr.mxu0 %v4331_v14 }
  0x4e   :  { %892 = vmatpush1.msra.mxu1 %v4435_v40  ;;  %811 = vmatpush1.msra.mxu0 %v4337_v16 }
  0x4f   :  { %893 = vmatprep.subr.mxu1 %v4451_v44  ;;  %844 = vmatprep.mubr.f32.mxu0 %v5761_v0 }
  0x50   :  { %894 = vmatpush1.msra.mxu1 %v4459_v48  ;;  %927 = vmatprep.mubr.f32.mxu1 %v5761_v0 }
  0x51   :  { %3520 = vmatmul.mubr.msk.f32.vlgmr.msra.gmra.mxu0 %vm180_vm1, %v4374_v25  ;;  %3525 = vmatmul.mubr.msk.f32.vlgmr.msra.gmra.mxu1 %vm180_vm1, %v4486_v53 }
  0x52   :  { %3528 = vmatprep.subr.msk.mxu0 %vm172_vm0, %v4362_v23  ;;  %3533 = vmatprep.subr.msk.mxu1 %vm172_vm0, %v4490_v54 }
  0x53   :  { %3529 = vmatpush1.msk.msra.mxu0 %vm172_vm0, %v4389_v29  ;;  %850 = vmatprep.mubr.f32.mxu0 %v5761_v0 }
  0x54   :  { %933 = vmatprep.mubr.f32.mxu1 %v5761_v0  ;;  %978 = vmatprep.subr.mxu0 %v4412_v35 }
  0x55   :  { %3534 = vmatpush1.msk.msra.mxu1 %vm172_vm0, %v4495_v56  ;;  %3521 = vmatmul.mubr.msk.f32.gmra.mxu0 %vm180_vm1, %v4392_v30 }
  0x56   :  { %3526 = vmatmul.mubr.msk.f32.gmra.mxu1 %vm180_vm1, %v4521_v60  ;;  %979 = vmatpush1.msra.mxu0 %v4420_v37 }
  0x57   :  { %1073 = vmatprep.subr.mxu1 %v4506_v58  ;;  %980 = vmatprep.subr.mxu0 %v4449_v43 }
  0x58   :  { %1074 = vmatpush1.msra.mxu1 %v4523_v61  ;;  %856 = vmatprep.mubr.f32.mxu0 %v5761_v0 }
  0x59   :  { %939 = vmatprep.mubr.f32.mxu1 %v5761_v0  ;;  %981 = vmatpush1.msra.mxu0 %v4457_v47 }
  0x5a   :  { %3522 = vmatmul.mubr.msk.f32.gmra.mxu0 %vm180_vm1, %v4440_v41  ;;  %3527 = vmatmul.mubr.msk.f32.gmra.mxu1 %vm180_vm1, %v4547_v34 }
  0x5b   :  { %1075 = vmatprep.subr.mxu1 %v4528_v63  ;;  %982 = vmatprep.subr.mxu0 %v4465_v49 }
  0x5c   :  { %1076 = vmatpush1.msra.mxu1 %v4537_v20  ;;  %983 = vmatpush1.msra.mxu0 %v4474_v51 }
  0x5d   :  { %1077 = vmatprep.subr.mxu1 %v4553_v19  ;;  %1016 = vmatprep.mubr.f32.mxu0 %v5761_v0 }
  0x5e   :  { %1078 = vmatpush1.msra.mxu1 %v4557_v57  ;;  %1111 = vmatprep.mubr.f32.mxu1 %v5761_v0 }
  0x5f   :  { %3530 = vmatmul.mubr.msk.f32.vlgmr.msra.gmra.mxu0 %vm180_vm1, %v4569_v32  ;;  %3535 = vmatmul.mubr.msk.f32.vlgmr.msra.gmra.mxu1 %vm180_vm1, %v4347_v18 }
  0x60   :  { %3538 = vmatprep.subr.msk.mxu0 %vm172_vm0, %v4293_v1  ;;  %3543 = vmatprep.subr.msk.mxu1 %vm172_vm0, %v4295_v2 }
  0x61   :  { %3539 = vmatpush1.msk.msra.mxu0 %vm172_vm0, %v4297_v3  ;;  %1022 = vmatprep.mubr.f32.mxu0 %v5761_v0 }
  0x62   :  { %1117 = vmatprep.mubr.f32.mxu1 %v5761_v0  ;;  %1191 = vmatprep.subr.mxu0 %v4305_v5 }
  0x63   :  { %3544 = vmatpush1.msk.msra.mxu1 %vm172_vm0, %v4303_v4  ;;  %3531 = vmatmul.mubr.msk.f32.gmra.mxu0 %vm180_vm1, %v4584_v42 }
  0x64   :  { %3536 = vmatmul.mubr.msk.f32.gmra.mxu1 %vm180_vm1, %v4367_v24  ;;  %1192 = vmatpush1.msra.mxu0 %v4313_v7 }
  0x65   :  { %1274 = vmatprep.subr.mxu1 %v4307_v6  ;;  %1193 = vmatprep.subr.mxu0 %v4317_v9 }
  0x66   :  { %1275 = vmatpush1.msra.mxu1 %v4315_v8  ;;  %1028 = vmatprep.mubr.f32.mxu0 %v5761_v0 }
  0x67   :  { %1123 = vmatprep.mubr.f32.mxu1 %v5761_v0  ;;  %1194 = vmatpush1.msra.mxu0 %v4323_v11 }
  0x68   :  { %3532 = vmatmul.mubr.msk.f32.gmra.mxu0 %vm180_vm1, %v4603_v55  ;;  %3537 = vmatmul.mubr.msk.f32.gmra.mxu1 %vm180_vm1, %v4397_v31 }
  0x69   :  { %1276 = vmatprep.subr.mxu1 %v4321_v10  ;;  %1195 = vmatprep.subr.mxu0 %v4329_v13 }
  0x6a   :  { %1277 = vmatpush1.msra.mxu1 %v4325_v12  ;;  %1196 = vmatpush1.msra.mxu0 %v4333_v15 }
  0x6b   :  { %1278 = vmatprep.subr.mxu1 %v4331_v14  ;;  %1229 = vmatprep.mubr.f32.mxu0 %v5761_v0 }
  0x6c   :  { %1279 = vmatpush1.msra.mxu1 %v4337_v16  ;;  %1312 = vmatprep.mubr.f32.mxu1 %v5761_v0 }
  0x6d   :  { %3540 = vmatmul.mubr.msk.f32.vlgmr.msra.gmra.mxu0 %vm180_vm1, %v4486_v53  ;;  %3545 = vmatmul.mubr.msk.f32.vlgmr.msra.gmra.mxu1 %vm180_vm1, %v4481_v52 }
  0x6e   :  { %3548 = vmatprep.subr.msk.mxu0 %vm172_vm0, %v4360_v22  ;;  %3553 = vmatprep.subr.msk.mxu1 %vm172_vm0, %v4362_v23 }
  0x6f   :  { %3549 = vmatpush1.msk.msra.mxu0 %vm172_vm0, %v4376_v26  ;;  %1235 = vmatprep.mubr.f32.mxu0 %v5761_v0 }
  0x70   :  { %1318 = vmatprep.mubr.f32.mxu1 %v5761_v0  ;;  %1357 = vmatprep.subr.mxu0 %v4383_v28 }
  0x71   :  { %3554 = vmatpush1.msk.msra.mxu1 %vm172_vm0, %v4389_v29  ;;  %3541 = vmatmul.mubr.msk.f32.gmra.mxu0 %vm180_vm1, %v4521_v60 }
  0x72   :  { %3546 = vmatmul.mubr.msk.f32.gmra.mxu1 %vm180_vm1, %v4515_v59  ;;  %1358 = vmatpush1.msra.mxu0 %v4407_v33 }
  0x73   :  { %1446 = vmatprep.subr.mxu1 %v4412_v35  ;;  %1359 = vmatprep.subr.mxu0 %v4414_v36 }
  0x74   :  { %1447 = vmatpush1.msra.mxu1 %v4420_v37  ;;  %1241 = vmatprep.mubr.f32.mxu0 %v5761_v0 }
  0x75   :  { %1324 = vmatprep.mubr.f32.mxu1 %v5761_v0  ;;  %1360 = vmatpush1.msra.mxu0 %v4435_v40 }
  0x76   :  { %3542 = vmatmul.mubr.msk.f32.gmra.mxu0 %vm180_vm1, %v4547_v34  ;;  %3547 = vmatmul.mubr.msk.f32.gmra.mxu1 %vm180_vm1, %v4544_v27 }
  0x77   :  { %1448 = vmatprep.subr.mxu1 %v4449_v43  ;;  %1361 = vmatprep.subr.mxu0 %v4451_v44 }
  0x78   :  { %1449 = vmatpush1.msra.mxu1 %v4457_v47  ;;  %1362 = vmatpush1.msra.mxu0 %v4459_v48 }
  0x79   :  { %1395 = vmatprep.mubr.f32.mxu0 %v5761_v0  ;;  %1450 = vmatprep.subr.mxu1 %v4465_v49 }
  0x7a   :  { %3550 = vmatmul.mubr.msk.f32.vlgmr.msra.gmra.mxu0 %vm180_vm1, %v4569_v32  ;;  %1451 = vmatpush1.msra.mxu1 %v4474_v51 }
  0x7b   :  { %1484 = vmatprep.mubr.f32.mxu1 %v5761_v0  ;;  %3558 = vmatprep.subr.msk.mxu0 %vm172_vm0, %v4490_v54 }
  0x7c   :  { %3555 = vmatmul.mubr.msk.f32.vlgmr.msra.gmra.mxu1 %vm180_vm1, %v4347_v18  ;;  %3559 = vmatpush1.msk.msra.mxu0 %vm172_vm0, %v4495_v56 }
  0x7d   :  { %3563 = vmatprep.subr.msk.mxu1 %vm172_vm0, %v4293_v1  ;;  %1401 = vmatprep.mubr.f32.mxu0 %v5761_v0  ;;  %v1510_v1 = vrot.slane %v4515_v59, 4 }
  0x7e   :  { %1547 = vmatprep.subr.mxu0 %v4506_v58  ;;  %3564 = vmatpush1.msk.msra.mxu1 %vm172_vm0, %v4297_v3 }
  0x7f   :  { %3551 = vmatmul.mubr.msk.f32.gmra.mxu0 %vm180_vm1, %v4584_v42  ;;  %1490 = vmatprep.mubr.f32.mxu1 %v5761_v0  ;;  %v4770_v3 = vsel %vm172_vm0, %v1509_v17, %v1510_v1 }
  0x80   :  { %1548 = vmatpush1.msra.mxu0 %v4523_v61  ;;  %3556 = vmatmul.mubr.msk.f32.gmra.mxu1 %vm180_vm1, %v4367_v24 }
  0x81   :  { %1636 = vmatprep.subr.mxu1 %v4305_v5  ;;  %1549 = vmatprep.subr.mxu0 %v4528_v63  ;;  %v1512_v5 = vrot.slane %v4544_v27, 4 }
  0x82   :  { %1637 = vmatpush1.msra.mxu1 %v4313_v7  ;;  %1407 = vmatprep.mubr.f32.mxu0 %v5761_v0 }
  0x83   :  { %1550 = vmatpush1.msra.mxu0 %v4537_v20  ;;  %1496 = vmatprep.mubr.f32.mxu1 %v5761_v0  ;;  %v1513_v7 = vsel %vm172_vm0, %v1510_v1, %v1512_v5 }
  0x84   :  { %3552 = vmatmul.mubr.msk.f32.gmra.mxu0 %vm180_vm1, %v4603_v55  ;;  %1638 = vmatprep.subr.mxu1 %v4317_v9 }
  0x85   :  { %3557 = vmatmul.mubr.msk.f32.gmra.mxu1 %vm180_vm1, %v4397_v31  ;;  %1551 = vmatprep.subr.mxu0 %v4553_v19 }
  0x86   :  { %1639 = vmatpush1.msra.mxu1 %v4323_v11  ;;  %1552 = vmatpush1.msra.mxu0 %v4557_v57 }
  0x87   :  { %1585 = vmatprep.mubr.f32.mxu0 %v5761_v0  ;;  %1640 = vmatprep.subr.mxu1 %v4329_v13 }
  0x88   :  { %3560 = vmatmul.mubr.msk.f32.vlgmr.msra.gmra.mxu0 %vm180_vm1, %v4770_v3  ;;  %1641 = vmatpush1.msra.mxu1 %v4333_v15 }
  0x89   :  { %1674 = vmatprep.mubr.f32.mxu1 %v5761_v0  ;;  %3568 = vmatprep.subr.msk.mxu0 %vm172_vm0, %v4295_v2  ;;  %v5779_v2 = vrot.slane %v4425_v38, 4 }
  0x8a   :  { %3565 = vmatmul.mubr.msk.f32.vlgmr.msra.gmra.mxu1 %vm180_vm1, %v4569_v32  ;;  %3569 = vmatpush1.msk.msra.mxu0 %vm172_vm0, %v4303_v4 }
  0x8b   :  { %3573 = vmatprep.subr.msk.mxu1 %vm172_vm0, %v4360_v22  ;;  %1591 = vmatprep.mubr.f32.mxu0 %v5761_v0  ;;  %v1514_v4 = vsel %vm172_vm0, %v1512_v5, %v5779_v2 }
  0x8c   :  { %1719 = vmatprep.subr.mxu0 %v4307_v6  ;;  %3574 = vmatpush1.msk.msra.mxu1 %vm172_vm0, %v4376_v26  ;;  %v5780_v6 = vld [vmem:[#allocation11_spill] sm:$0xff] }
  0x8d   :  { %3561 = vmatmul.mubr.msk.f32.gmra.mxu0 %vm180_vm1, %v1513_v7  ;;  %1680 = vmatprep.mubr.f32.mxu1 %v5761_v0 }
  0x8e   :  { %1720 = vmatpush1.msra.mxu0 %v4315_v8  ;;  %3566 = vmatmul.mubr.msk.f32.gmra.mxu1 %vm180_vm1, %v4584_v42 }
  0x8f   :  { %1802 = vmatprep.subr.mxu1 %v4383_v28  ;;  %1721 = vmatprep.subr.mxu0 %v4321_v10 }
  0x90   :  { %1803 = vmatpush1.msra.mxu1 %v4407_v33  ;;  %1597 = vmatprep.mubr.f32.mxu0 %v5761_v0 }
  0x91   :  { %1722 = vmatpush1.msra.mxu0 %v4325_v12  ;;  %1686 = vmatprep.mubr.f32.mxu1 %v5761_v0 }
  0x92   :  { %3562 = vmatmul.mubr.msk.f32.gmra.mxu0 %vm180_vm1, %v1514_v4  ;;  %1804 = vmatprep.subr.mxu1 %v4414_v36 }
  0x93   :  { %3567 = vmatmul.mubr.msk.f32.gmra.mxu1 %vm180_vm1, %v4603_v55  ;;  %1723 = vmatprep.subr.mxu0 %v4331_v14 }
  0x94   :  { %1805 = vmatpush1.msra.mxu1 %v4435_v40  ;;  %1724 = vmatpush1.msra.mxu0 %v4337_v16 }
  0x95   :  { %1757 = vmatprep.mubr.f32.mxu0 %v5761_v0  ;;  %1806 = vmatprep.subr.mxu1 %v4451_v44 }
  0x96   :  { %3570 = vmatmul.mubr.msk.f32.vlgmr.msra.gmra.mxu0 %vm180_vm1, %v4486_v53  ;;  %1807 = vmatpush1.msra.mxu1 %v4459_v48 }
  0x97   :  { %1840 = vmatprep.mubr.f32.mxu1 %v5761_v0  ;;  %3578 = vmatprep.subr.msk.mxu0 %vm172_vm0, %v4362_v23 }
  0x98   :  { %3575 = vmatmul.mubr.msk.f32.vlgmr.msra.gmra.mxu1 %vm180_vm1, %v4347_v18  ;;  %3579 = vmatpush1.msk.msra.mxu0 %vm172_vm0, %v4389_v29 }
  0x99   :  { %3583 = vmatprep.subr.msk.mxu1 %vm172_vm0, %v4490_v54  ;;  %1763 = vmatprep.mubr.f32.mxu0 %v5761_v0 }
  0x9a   :  { %1891 = vmatprep.subr.mxu0 %v4412_v35  ;;  %3584 = vmatpush1.msk.msra.mxu1 %vm172_vm0, %v4495_v56 }
  0x9b   :  { %3571 = vmatmul.mubr.msk.f32.gmra.mxu0 %vm180_vm1, %v4521_v60  ;;  %1846 = vmatprep.mubr.f32.mxu1 %v5761_v0 }
  0x9c   :  { %1892 = vmatpush1.msra.mxu0 %v4420_v37  ;;  %3576 = vmatmul.mubr.msk.f32.gmra.mxu1 %vm180_vm1, %v4367_v24 }
  0x9d   :  { %1986 = vmatprep.subr.mxu1 %v4506_v58  ;;  %1893 = vmatprep.subr.mxu0 %v4449_v43 }
  0x9e   :  { %1987 = vmatpush1.msra.mxu1 %v4523_v61  ;;  %1769 = vmatprep.mubr.f32.mxu0 %v5761_v0 }
  0x9f   :  { %1894 = vmatpush1.msra.mxu0 %v4457_v47  ;;  %1852 = vmatprep.mubr.f32.mxu1 %v5761_v0 }
  0xa0   :  { %3572 = vmatmul.mubr.msk.f32.gmra.mxu0 %vm180_vm1, %v4547_v34  ;;  %1988 = vmatprep.subr.mxu1 %v4528_v63 }
  0xa1   :  { %3577 = vmatmul.mubr.msk.f32.gmra.mxu1 %vm180_vm1, %v4397_v31  ;;  %1895 = vmatprep.subr.mxu0 %v4465_v49 }
  0xa2   :  { %1989 = vmatpush1.msra.mxu1 %v4537_v20  ;;  %1896 = vmatpush1.msra.mxu0 %v4474_v51 }
  0xa3   :  { %1929 = vmatprep.mubr.f32.mxu0 %v5761_v0  ;;  %1990 = vmatprep.subr.mxu1 %v4553_v19 }
  0xa4   :  { %3580 = vmatmul.mubr.msk.f32.vlgmr.msra.gmra.mxu0 %vm180_vm1, %v4770_v3  ;;  %1991 = vmatpush1.msra.mxu1 %v4557_v57 }
  0xa5   :  { %2024 = vmatprep.mubr.f32.mxu1 %v5761_v0  ;;  %1935 = vmatprep.mubr.f32.mxu0 %v5761_v0 }
  0xa6   :  { %3585 = vmatmul.mubr.msk.f32.vlgmr.msra.gmra.mxu1 %vm180_vm1, %v4430_v39 }
  0xa7   :  { %2030 = vmatprep.mubr.f32.mxu1 %v5761_v0 }
  0xa8   :  { %3581 = vmatmul.mubr.msk.f32.gmra.mxu0 %vm180_vm1, %v1513_v7  ;;  %v1143_v7 = vlaneseq }
  0xa9   :  { %1941 = vmatprep.mubr.f32.mxu0 %v5761_v0 }
  0xaa   :  { %3586 = vmatmul.mubr.msk.f32.gmra.mxu1 %vm180_vm1, %v4470_v50 }
  0xab   :  { %2036 = vmatprep.mubr.f32.mxu1 %v5761_v0 }
  0xac   :  { %3582 = vmatmul.mubr.msk.f32.gmra.mxu0 %vm180_vm1, %v1514_v4 }
  0xae   :  { %3587 = vmatmul.mubr.msk.f32.gmra.mxu1 %vm180_vm1, %v5780_v6 }
  0xe7   :  { %v4873_v9 = vpop.f32.mrf.mxu1 }
  0xe8   :  { %v4871_v8 = vpop.f32.mrf.mxu0 }
  0xe9   :  { %v4877_v11 = vpop.f32.mrf.mxu1 }
  0xea   :  { %v4875_v10 = vpop.f32.mrf.mxu0 }
  0xec   :  { %v265_v12 = vpop.f32.mrf.mxu0  ;;  %v363_v13 = vpop.f32.mrf.mxu1 }
  0xed   :  { %v364_v14 = vadd.f32 %v363_v13, %v265_v12  ;;  %v358_v13 = vadd.f32 %v4873_v9, %v4871_v8 }
  0xee   :  { %v267_v15 = vpop.f32.mrf.mxu0  ;;  %v365_v16 = vpop.f32.mrf.mxu1 }
  0xef   :  { %v366_v18 = vadd.f32 %v365_v16, %v267_v15 }
  0xf0   :  { %v271_v19 = vpop.f32.mrf.mxu0  ;;  %v369_v22 = vpop.f32.mrf.mxu1 }
  0xf1   :  { %v370_v23 = vadd.f32 %v369_v22, %v271_v19  ;;  %v1144_v19 = vshrl.u32 %v1143_v7, 7  ;;  %v360_v22 = vadd.f32 %v4877_v11, %v4875_v10 }
  0xf2   :  { %v273_v24 = vpop.f32.mrf.mxu0  ;;  %v371_v25 = vpop.f32.mrf.mxu1 }
  0xf3   :  { %v372_v26 = vadd.f32 %v371_v25, %v273_v24 }
  0xf5   :  { %v455_v28 = vpop.f32.mrf.mxu0  ;;  %v4879_v29 = vpop.f32.mrf.mxu1 }
  0xf6   :  { %v472_v24 = vadd.f32 %v455_v28, %v358_v13 }
  0xf7   :  { %v457_v30 = vpop.f32.mrf.mxu0  ;;  %v4881_v31 = vpop.f32.mrf.mxu1 }
  0xf8   :  { %v584_v10 = vadd.f32 %v4879_v29, %v472_v24  ;;  %v4910_v29 = vld [vmem:[%s5749_s3 + $0x80] sm:$0xff] }
  0xf9   :  { %v461_v33 = vpop.f32.mrf.mxu0  ;;  %5782 = vst [vmem:[#allocation12_spill] sm:$0xff] %v4910_v29 }
  0xfa   :  { %v474_v35 = vadd.f32 %v461_v33, %v364_v14  ;;  %v573_v36 = vpop.f32.mrf.mxu1 }
  0xfb   :  { %v463_v37 = vpop.f32.mrf.mxu0 }
  0xfc   :  { %v586_v38 = vadd.f32 %v573_v36, %v474_v35  ;;  %v475_v39 = vadd.f32 %v463_v37, %v366_v18  ;;  %v575_v40 = vpop.f32.mrf.mxu1  ;;  %v473_v35 = vadd.f32 %v457_v30, %v360_v22 }
  0xfe   :  { %v587_v41 = vadd.f32 %v575_v40, %v475_v39  ;;  %v467_v43 = vpop.f32.mrf.mxu0  ;;  %v579_v44 = vpop.f32.mrf.mxu1  ;;  %v1145_v39 = vsub.s32 0, %v1144_v19 }
  0xff   :  { %v476_v47 = vadd.f32 %v467_v43, %v370_v23  ;;  %v1149_v43 = vsub.s32 1, %v1144_v19 }
 0x100   :  { %v469_v48 = vpop.f32.mrf.mxu0  ;;  %v581_v49 = vpop.f32.mrf.mxu1 }
 0x101   :  { %v588_v50 = vadd.f32 %v579_v44, %v476_v47  ;;  %v477_v51 = vadd.f32 %v469_v48, %v372_v26  ;;  %v585_v44 = vadd.f32 %v4881_v31, %v473_v35 }
 0x103   :  { %v589_v52 = vadd.f32 %v581_v49, %v477_v51  ;;  %v674_v53 = vpop.f32.mrf.mxu0  ;;  %v763_v54 = vpop.f32.mrf.mxu1 }
 0x104   :  { %v691_v48 = vadd.f32 %v674_v53, %v584_v10  ;;  %v4918_v53 = vld [vmem:[%s5749_s3 + $0x40] sm:$0xff] }
 0x105   :  { %v676_v56 = vpop.f32.mrf.mxu0  ;;  %v765_v57 = vpop.f32.mrf.mxu1  ;;  %5783 = vst [vmem:[#allocation13_spill] sm:$0xff] %v4918_v53  ;;  %3814 = vmatprep.subr.mxu1 %v4918_v53 }
 0x106   :  { %3815 = vmatpush3.msra.mxu1 %v4918_v53 }
 0x107   :  { %v680_v58 = vpop.f32.mrf.mxu0 }
 0x108   :  { %v4883_v59 = vadd.f32 %v680_v58, %v586_v38  ;;  %v769_v60 = vpop.f32.mrf.mxu1 }
 0x109   :  { %v682_v61 = vpop.f32.mrf.mxu0 }
 0x10a   :  { %v4885_v62 = vadd.f32 %v682_v61, %v587_v41  ;;  %v771_v63 = vpop.f32.mrf.mxu1  ;;  %v166_v41 = vld [vmem:[%s5748_s2] sm:$0x3] }
 0x10b   :  { %v4900_v51 = vrot.slane %v166_v41, %v1145_v39  ;;  %v4912_v31 = vrot.slane %v166_v41, %v1149_v43 }
 0x10c   :  { %v686_v20 = vpop.f32.mrf.mxu0  ;;  %v775_v27 = vpop.f32.mrf.mxu1 }
 0x10d   :  { %v4887_v34 = vadd.f32 %v686_v20, %v588_v50  ;;  %v4930_v20 = vld [vmem:[%s5749_s3 + $0x38] sm:$0xff] }
 0x10e   :  { %v688_v46 = vpop.f32.mrf.mxu0  ;;  %v777_v21 = vpop.f32.mrf.mxu1  ;;  %5785 = vst [vmem:[#allocation15_spill] sm:$0xff] %v4930_v20  ;;  %3816 = vmatprep.subr.mxu1 %v4930_v20 }
 0x10f   :  { %v4889_v32 = vadd.f32 %v688_v46, %v589_v52  ;;  %v4905_v52 = vld [vmem:[%s5749_s3 + $0x88] sm:$0xff]  ;;  %3817 = vmatpush3.msra.mxu1 %v4930_v20 }
 0x110   :  { %5781 = vst [vmem:[#allocation11_spill] sm:$0xff] %v4905_v52  ;;  %3793 = vmatprep.subr.mxu0 %v4905_v52 }
 0x111   :  { %v846_v42 = vpop.f32.mrf.mxu0  ;;  %v929_v45 = vpop.f32.mrf.mxu1  ;;  %3794 = vmatpush3.msra.mxu0 %v4905_v52  ;;  %v5006_v52 = vld [vmem:[%s5749_s3 + $0x68] sm:$0xff] }
 0x112   :  { %v847_v14 = vadd.f32 %v846_v42, %v763_v54  ;;  %v692_v54 = vadd.f32 %v676_v56, %v585_v44  ;;  %v4924_v56 = vld [vmem:[%s5749_s3 + $0x78] sm:$0xff]  ;;  %3795 = vmatprep.subr.mxu0 %v4910_v29 }
 0x113   :  { %v848_v55 = vpop.f32.mrf.mxu0  ;;  %v931_v17 = vpop.f32.mrf.mxu1  ;;  %5784 = vst [vmem:[#allocation14_spill] sm:$0xff] %v4924_v56  ;;  %3796 = vmatpush3.msra.mxu0 %v4910_v29 }
 0x114   :  { %v849_v25 = vadd.f32 %v848_v55, %v765_v57  ;;  %v946_v38 = vadd.f32 %v929_v45, %v847_v14  ;;  %3797 = vmatprep.subr.mxu0 %v4924_v56 }
 0x115   :  { %v852_v1 = vpop.f32.mrf.mxu0  ;;  %3798 = vmatpush3.msra.mxu0 %v4924_v56 }
 0x116   :  { %v853_v3 = vadd.f32 %v852_v1, %v769_v60  ;;  %v935_v5 = vpop.f32.mrf.mxu1  ;;  %v947_v11 = vadd.f32 %v931_v17, %v849_v25  ;;  %v4943_v17 = vld [vmem:[%s5749_s3 + $0x70] sm:$0xff] }
 0x117   :  { %v854_v2 = vpop.f32.mrf.mxu0  ;;  %5787 = vst [vmem:[#allocation17_spill] sm:$0xff] %v4943_v17  ;;  %3799 = vmatprep.subr.mxu0 %v4943_v17 }
 0x118   :  { %v948_v4 = vadd.f32 %v935_v5, %v853_v3  ;;  %v855_v6 = vadd.f32 %v854_v2, %v771_v63  ;;  %v937_v12 = vpop.f32.mrf.mxu1  ;;  %3800 = vmatpush3.msra.mxu0 %v4943_v17 }
 0x119   :  { %3801 = vmatprep.subr.mxu0 %v5006_v52 }
 0x11a   :  { %v949_v15 = vadd.f32 %v937_v12, %v855_v6  ;;  %v858_v16 = vpop.f32.mrf.mxu0  ;;  %v941_v18 = vpop.f32.mrf.mxu1  ;;  %3802 = vmatpush3.msra.mxu0 %v5006_v52 }
 0x11b   :  { %v859_v23 = vadd.f32 %v858_v16, %v775_v27 }
 0x11c   :  { %v860_v26 = vpop.f32.mrf.mxu0  ;;  %v943_v33 = vpop.f32.mrf.mxu1 }
 0x11d   :  { %v950_v36 = vadd.f32 %v941_v18, %v859_v23  ;;  %v861_v37 = vadd.f32 %v860_v26, %v777_v21 }
 0x11f   :  { %v951_v40 = vadd.f32 %v943_v33, %v861_v37  ;;  %v1018_v8 = vpop.f32.mrf.mxu0  ;;  %v1113_v9 = vpop.f32.mrf.mxu1 }
 0x120   :  { %v1035_v28 = vadd.f32 %v1018_v8, %v946_v38 }
 0x121   :  { %v1020_v47 = vpop.f32.mrf.mxu0  ;;  %v1115_v30 = vpop.f32.mrf.mxu1 }
 0x122   :  { %v1130_v49 = vadd.f32 %v1113_v9, %v1035_v28  ;;  %v1036_v50 = vadd.f32 %v1020_v47, %v947_v11 }
 0x123   :  { %v1024_v57 = vpop.f32.mrf.mxu0 }
 0x124   :  { %v1136_v58 = vmax.f32 %v691_v48, %v1130_v49  ;;  %v1131_v60 = vadd.f32 %v1115_v30, %v1036_v50  ;;  %v1037_v61 = vadd.f32 %v1024_v57, %v948_v4  ;;  %v1119_v63 = vpop.f32.mrf.mxu1 }
 0x125   :  { %v1026_v27 = vpop.f32.mrf.mxu0 }
 0x126   :  { %v1137_v46 = vmax.f32 %v692_v54, %v1131_v60  ;;  %v4934_v21 = vadd.f32 %v1119_v63, %v1037_v61  ;;  %v1038_v42 = vadd.f32 %v1026_v27, %v949_v15  ;;  %v1121_v45 = vpop.f32.mrf.mxu1  ;;  %v4937_v55 = vadd.f32 %v4900_v51, %v1136_v58 }
 0x128   :  { %5786 = vst [vmem:[#allocation16_spill] sm:$0xff] %v4937_v55  ;;  %v4949_v3 = vadd.f32 %v1121_v45, %v1038_v42  ;;  %v1030_v5 = vpop.f32.mrf.mxu0  ;;  %v1125_v7 = vpop.f32.mrf.mxu1  ;;  %v5763_v2 = vmax.f32 %v4937_v55, 0.0  ;;  %v1154_v4 = vadd.f32 %v4912_v31, %v1137_v46  ;;  %v5011_v55 = vld [vmem:[%s5749_s3 + $0x30] sm:$0xff] }
 0x129   :  { %v1039_v6 = vadd.f32 %v1030_v5, %v950_v36  ;;  %3818 = vmatprep.subr.mxu1 %v5011_v55 }
 0x12a   :  { %v1032_v13 = vpop.f32.mrf.mxu0  ;;  %v1127_v14 = vpop.f32.mrf.mxu1  ;;  %2073 = vrot.lane.b32.xlu0 %v5763_v2, %s4221_s29  ;;  %v1160_v15 = vmax.f32 %v1154_v4, 0.0  ;;  %3819 = vmatpush3.msra.mxu1 %v5011_v55 }
 0x12b   :  { %v4962_v16 = vadd.f32 %v1125_v7, %v1039_v6  ;;  %v1040_v18 = vadd.f32 %v1032_v13, %v951_v40 }
 0x12c   :  { %2075 = vrot.lane.b32.xlu1 %v1160_v15, %s4221_s29 }
 0x12d   :  { %v4967_v22 = vadd.f32 %v1127_v14, %v1040_v18  ;;  %v1231_v23 = vpop.f32.mrf.mxu0  ;;  %v1314_v24 = vpop.f32.mrf.mxu1 }
 0x12e   :  { %v1315_v19 = vadd.f32 %v1314_v24, %v1231_v23  ;;  %v5016_v23 = vld [vmem:[%s5749_s3 + $0x60] sm:$0xff] }
 0x12f   :  { %v1233_v26 = vpop.f32.mrf.mxu0  ;;  %v1316_v33 = vpop.f32.mrf.mxu1  ;;  %3803 = vmatprep.subr.mxu0 %v5016_v23 }
 0x130   :  { %v1317_v1 = vadd.f32 %v1316_v33, %v1233_v26  ;;  %3804 = vmatpush3.msra.mxu0 %v5016_v23 }
 0x131   :  { %v1237_v35 = vpop.f32.mrf.mxu0 }
 0x132   :  { %v1320_v36 = vpop.f32.mrf.mxu1 }
 0x133   :  { %v1239_v37 = vpop.f32.mrf.mxu0  ;;  %v1321_v20 = vadd.f32 %v1320_v36, %v1237_v35  ;;  %v5023_v35 = vld [vmem:[%s5749_s3 + $0x28] sm:$0xff] }
 0x134   :  { %v1322_v38 = vpop.f32.mrf.mxu1  ;;  %3820 = vmatprep.subr.mxu1 %v5023_v35 }
 0x135   :  { %v1323_v24 = vadd.f32 %v1322_v38, %v1239_v37  ;;  %3821 = vmatpush3.msra.mxu1 %v5023_v35 }
 0x136   :  { %v4971_v39 = vpop.f32.mrf.mxu0  ;;  %v4973_v40 = vpop.f32.mrf.mxu1 }
 0x138   :  { %v4975_v8 = vpop.f32.mrf.mxu0  ;;  %v4977_v9 = vpop.f32.mrf.mxu1 }
 0x13a   :  { %v1397_v41 = vpop.f32.mrf.mxu0 }
 0x13b   :  { %v1414_v17 = vadd.f32 %v1397_v41, %v1315_v19 }
 0x13c   :  { %v1486_v43 = vpop.f32.mrf.mxu1  ;;  %v1399_v10 = vpop.f32.mrf.mxu0 }
 0x13d   :  { %v1415_v26 = vadd.f32 %v1399_v10, %v1317_v1  ;;  %v1503_v38 = vadd.f32 %v1486_v43, %v1414_v17  ;;  %v5044_v17 = vld [vmem:[%s5749_s3 + $0x20] sm:$0xff] }
 0x13e   :  { %v4979_v11 = vpop.f32.mrf.mxu1  ;;  %3822 = vmatprep.subr.mxu1 %v5044_v17 }
 0x13f   :  { %v1403_v28 = vpop.f32.mrf.mxu0  ;;  %3823 = vmatpush3.msra.mxu1 %v5044_v17 }
 0x140   :  { %v1492_v44 = vpop.f32.mrf.mxu1  ;;  %v1416_v19 = vadd.f32 %v1403_v28, %v1321_v20 }
 0x141   :  { %v1405_v47 = vpop.f32.mrf.mxu0 }
 0x142   :  { %v4981_v30 = vpop.f32.mrf.mxu1  ;;  %v1417_v1 = vadd.f32 %v1405_v47, %v1323_v24 }
 0x144   :  { %v4983_v48 = vpop.f32.mrf.mxu0 }
 0x145   :  { %v4985_v49 = vpop.f32.mrf.mxu1 }
 0x146   :  { %v4987_v50 = vpop.f32.mrf.mxu0 }
 0x147   :  { %v4989_v54 = vpop.f32.mrf.mxu1 }
 0x148   :  { %v1587_v57 = vpop.f32.mrf.mxu0 }
 0x14a   :  { %v1676_v58 = vpop.f32.mrf.mxu1  ;;  %v4991_v60 = vpop.f32.mrf.mxu0 }
 0x14c   :  { %v1678_v61 = vpop.f32.mrf.mxu1 }
 0x14d   :  { %v4993_v63 = vpop.f32.mrf.mxu0 }
 0x14e   :  { %v1682_v27 = vpop.f32.mrf.mxu1 }
 0x14f   :  { %v4995_v46 = vpop.f32.mrf.mxu0 }
 0x150   :  { %v1684_v42 = vpop.f32.mrf.mxu1 }
 0x152   :  { %v4997_v45 = vpop.f32.mrf.mxu0 }
 0x153   :  { %v1688_v5 = vpop.f32.mrf.mxu1 }
 0x154   :  { %v4999_v7 = vpop.f32.mrf.mxu0 }
 0x155   :  { %v5001_v4 = vpop.f32.mrf.mxu1 }
 0x156   :  { %v1759_v6 = vpop.f32.mrf.mxu0 }
 0x157   :  { %v1760_v12 = vadd.f32 %v1759_v6, %v1676_v58  ;;  %v1604_v6 = vadd.f32 %v1587_v57, %v1503_v38  ;;  %v5087_v38 = vld [vmem:[%s5749_s3 + $0xd0] sm:$0xff] }
 0x158   :  { %v1842_v13 = vpop.f32.mrf.mxu1  ;;  %v1761_v14 = vpop.f32.mrf.mxu0 }
 0x159   :  { %v1762_v56 = vadd.f32 %v1761_v14, %v1678_v61  ;;  %v1859_v36 = vadd.f32 %v1842_v13, %v1760_v12  ;;  %v1327_v12 = vadd.f32 %v4973_v40, %v4971_v39  ;;  %v1504_v61 = vadd.f32 %v4979_v11, %v1415_v26 }
 0x15a   :  { %v1844_v15 = vpop.f32.mrf.mxu1  ;;  %v1506_v39 = vadd.f32 %v4981_v30, %v1417_v1  ;;  %v5055_v30 = vld [vmem:[%s5749_s3 + $0x50] sm:$0xff] }
 0x15b   :  { %v1765_v18 = vpop.f32.mrf.mxu0  ;;  %v1860_v10 = vadd.f32 %v1844_v15, %v1762_v56  ;;  %v5039_v56 = vld [vmem:[%s5749_s3 + $0x58] sm:$0xff] }
 0x15c   :  { %v1848_v0 = vpop.f32.mrf.mxu1  ;;  %v1766_v41 = vadd.f32 %v1765_v18, %v1682_v27  ;;  %v1505_v27 = vadd.f32 %v1492_v44, %v1416_v19  ;;  %3805 = vmatprep.subr.mxu0 %v5039_v56 }
 0x15d   :  { %v1767_v2 = vpop.f32.mrf.mxu0  ;;  %3806 = vmatpush3.msra.mxu0 %v5039_v56 }
 0x15e   :  { %v1850_v25 = vpop.f32.mrf.mxu1  ;;  %v1768_v20 = vadd.f32 %v1767_v2, %v1684_v42  ;;  %v1861_v13 = vadd.f32 %v1848_v0, %v1766_v41  ;;  %3807 = vmatprep.subr.mxu0 %v5055_v30 }
 0x15f   :  { %3808 = vmatpush3.msra.mxu0 %v5055_v30 }
 0x160   :  { %v1771_v53 = vpop.f32.mrf.mxu0  ;;  %v1862_v40 = vadd.f32 %v1850_v25, %v1768_v20  ;;  %v5060_v25 = vld [vmem:[%s5749_s3 + $0x18] sm:$0xff] }
 0x161   :  { %v1854_v29 = vpop.f32.mrf.mxu1  ;;  %v1772_v47 = vadd.f32 %v1771_v53, %v1688_v5  ;;  %v1605_v53 = vadd.f32 %v4991_v60, %v1504_v61  ;;  %v1606_v60 = vadd.f32 %v4993_v63, %v1505_v27  ;;  %3824 = vmatprep.subr.mxu1 %v5060_v25  ;;  %v5078_v63 = vld [vmem:[%s5749_s3 + $0x10] sm:$0xff] }
 0x162   :  { %v1773_v33 = vpop.f32.mrf.mxu0  ;;  %3825 = vmatpush3.msra.mxu1 %v5060_v25 }
 0x163   :  { %v5025_v58 = vpop.f32.mrf.mxu1  ;;  %v1863_v5 = vadd.f32 %v1854_v29, %v1772_v47  ;;  %v1774_v15 = vadd.f32 %v1773_v33, %v5001_v4  ;;  %v5073_v29 = vld [vmem:[%s5749_s3 + $0x48] sm:$0xff]  ;;  %v1418_v4 = vadd.f32 %v4983_v48, %v1327_v12  ;;  %v1607_v33 = vadd.f32 %v4995_v46, %v1506_v39  ;;  %3826 = vmatprep.subr.mxu1 %v5078_v63 }
 0x164   :  { %v1931_v37 = vpop.f32.mrf.mxu0  ;;  %3809 = vmatprep.subr.mxu0 %v5073_v29  ;;  %v5095_v48 = vld [vmem:[%s5749_s3 + $0x8] sm:$0xff]  ;;  %v1329_v46 = vadd.f32 %v4977_v9, %v4975_v8  ;;  %3827 = vmatpush3.msra.mxu1 %v5078_v63  ;;  %v5110_v8 = vld [vmem:[%s5749_s3] sm:$0xff] }
 0x165   :  { %v1948_v28 = vadd.f32 %v1931_v37, %v1859_v36  ;;  %3810 = vmatpush3.msra.mxu0 %v5073_v29  ;;  %v1864_v12 = vadd.f32 %v5025_v58, %v1774_v15  ;;  %v1507_v9 = vadd.f32 %v4985_v49, %v1418_v4  ;;  %3828 = vmatprep.subr.mxu1 %v5095_v48  ;;  %v5127_v49 = vld [vmem:[%s5749_s3 + $0x118] sm:$0xff] }
 0x166   :  { %v2026_v2 = vpop.f32.mrf.mxu1  ;;  %v1933_v42 = vpop.f32.mrf.mxu0  ;;  %3835 = vmatprep.subr.mxu0 %v5087_v38  ;;  %v1419_v58 = vadd.f32 %v4987_v50, %v1329_v46  ;;  %3829 = vmatpush3.msra.mxu1 %v5095_v48  ;;  %v5789_v50 = vmax.f32 %v4885_v62, %v4949_v3 }
 0x167   :  { %v2043_v14 = vadd.f32 %v2026_v2, %v1948_v28  ;;  %v1949_v18 = vadd.f32 %v1933_v42, %v1860_v10  ;;  %3830 = vmatprep.subr.mxu1 %v5110_v8 }
 0x168   :  { %v2028_v43 = vpop.f32.mrf.mxu1  ;;  %v1937_v11 = vpop.f32.mrf.mxu0  ;;  %3831 = vmatpush3.msra.mxu1 %v5110_v8 }
 0x169   :  { %v2049_v0 = vmax.f32 %v1604_v6, %v2043_v14  ;;  %v2044_v44 = vadd.f32 %v2028_v43, %v1949_v18  ;;  %v1950_v57 = vadd.f32 %v1937_v11, %v1861_v13  ;;  %v5788_v18 = vmax.f32 %v4883_v59, %v4934_v21  ;;  %3856 = vmatprep.subr.mxu1 %v5127_v49 }
 0x16a   :  { %v2032_v24 = vpop.f32.mrf.mxu1  ;;  %v1939_v26 = vpop.f32.mrf.mxu0  ;;  %v1608_v59 = vadd.f32 %v4997_v45, %v1507_v9  ;;  %v1508_v45 = vadd.f32 %v4989_v54, %v1419_v58 }
 0x16b   :  { %v2050_v19 = vmax.f32 %v1605_v53, %v2044_v44  ;;  %v2045_v36 = vadd.f32 %v2032_v24, %v1950_v57  ;;  %v1951_v41 = vadd.f32 %v1939_v26, %v1862_v40  ;;  %v5067_v1 = vadd.f32 %v2049_v0, %v4900_v51 }
 0x16c   :  { %v2034_v20 = vpop.f32.mrf.mxu1  ;;  %v1943_v37 = vpop.f32.mrf.mxu0  ;;  %v5118_v39 = vadd.f32 %v4900_v51, %v5788_v18  ;;  %v1156_v44 = vadd.f32 %v4912_v31, %v5789_v50  ;;  %v5790_v57 = vmax.f32 %v4887_v34, %v4962_v16  ;;  %v1609_v26 = vadd.f32 %v4999_v7, %v1508_v45  ;;  %v5209_v18 = vld [vmem:[%s5749_s3 + $0x110] sm:$0xff]  ;;  %v5236_v50 = vld [vmem:[%s5749_s3 + $0x108] sm:$0xff]  ;;  %v5252_v45 = vld [vmem:[%s5749_s3 + $0x100] sm:$0xff] }
 0x16d   :  { %v2051_v10 = vmax.f32 %v1606_v60, %v2045_v36  ;;  %v2046_v28 = vadd.f32 %v2034_v20, %v1951_v41  ;;  %v1952_v61 = vadd.f32 %v1943_v37, %v1863_v5  ;;  %v2061_v27 = vmax.f32 %v5067_v1, 0.0 }
 0x16e   :  { %v1945_v47 = vpop.f32.mrf.mxu0  ;;  %v2038_v2 = vpop.f32.mrf.mxu1  ;;  %v2056_v42 = vadd.f32 %v2050_v19, %v4912_v31  ;;  %v1161_v21 = vmax.f32 %v5118_v39, 0.0  ;;  %v5141_v60 = vadd.f32 %v4900_v51, %v5790_v57  ;;  %v1162_v62 = vmax.f32 %v1156_v44, 0.0  ;;  %v5247_v57 = vld [vmem:[%s5749_s3 + $0xa8] sm:$0xff] }
 0x16f   :  { %v2052_v6 = vmax.f32 %v1607_v33, %v2046_v28  ;;  %2101 = vrot.lane.b32.xlu0 %v2061_v27, %s4221_s29  ;;  %v2057_v13 = vadd.f32 %v2051_v10, %v4900_v51  ;;  %v1953_v14 = vadd.f32 %v1945_v47, %v1864_v12  ;;  %v2047_v53 = vadd.f32 %v2038_v2, %v1952_v61  ;;  %v5792_v33 = vld [vmem:[#allocation16_spill] sm:$0xff] }
 0x170   :  { %v2062_v43 = vmax.f32 %v2056_v42, 0.0  ;;  %v2040_v0 = vpop.f32.mrf.mxu1  ;;  %v1163_v3 = vmax.f32 %v5141_v60, 0.0  ;;  %v5791_v16 = vmax.f32 %v4889_v32, %v4967_v22  ;;  %v5793_v20 = vmax.f32 %v5792_v33, 0.0  ;;  %v5347_v33 = vld [vmem:[%s5749_s3 + $0x150] sm:$0xff] }
 0x171   :  { %v2063_v40 = vmax.f32 %v2057_v13, 0.0  ;;  %v2058_v11 = vadd.f32 %v2052_v6, %v4912_v31  ;;  %v2053_v5 = vmax.f32 %v1608_v59, %v2047_v53  ;;  %v2048_v15 = vadd.f32 %v2040_v0, %v1953_v14  ;;  %v5185_v6 = vld [vmem:[%s5749_s3 + $0xc8] sm:$0xff]  ;;  %v5204_v14 = vld [vmem:[%s5749_s3 + $0xb8] sm:$0xff]  ;;  %v5221_v0 = vld [vmem:[%s5749_s3 + $0xb0] sm:$0xff] }
 0x172   :  { %v1158_v54 = vadd.f32 %v4912_v31, %v5791_v16 }
 0x173   :  { %2105 = vrot.lane.b32.xlu1 %v2063_v40, %s4221_s29  ;;  %2103 = vrot.lane.b32.xlu0 %v2062_v43, %s4221_s29  ;;  %v2064_v24 = vmax.f32 %v2058_v11, 0.0  ;;  %v2054_v34 = vmax.f32 %v1609_v26, %v2048_v15  ;;  %v5155_v19 = vadd.f32 %v2053_v5, %v4900_v51  ;;  %v5271_v26 = vld [vmem:[%s5749_s3 + $0xf8] sm:$0xff] }
 0x174   :  { %v1164_v7 = vmax.f32 %v1158_v54, 0.0  ;;  %v5296_v54 = vld [vmem:[%s5749_s3 + $0x90] sm:$0xff] }
 0x175   :  { %v2065_v36 = vmax.f32 %v5155_v19, 0.0  ;;  %v2060_v41 = vadd.f32 %v2054_v34, %v4912_v31  ;;  %v5281_v34 = vld [vmem:[%s5749_s3 + $0x98] sm:$0xff]  ;;  %v5321_v19 = vld [vmem:[%s5749_s3 + $0x160] sm:$0xff] }
 0x177   :  { %2107 = vrot.lane.b32.xlu1 %v2064_v24, %s4221_s29  ;;  %2077 = vrot.lane.b32.xlu0 %v1161_v21, %s4221_s29  ;;  %v2066_v32 = vmax.f32 %v2060_v41, 0.0  ;;  %v5266_v24 = vld [vmem:[%s5749_s3 + $0xa0] sm:$0xff] }
 0x17b   :  { %2079 = vrot.lane.b32.xlu1 %v1162_v62, %s4221_s29  ;;  %2081 = vrot.lane.b32.xlu0 %v1163_v3, %s4221_s29 }
 0x17f   :  { %2083 = vrot.lane.b32.xlu1 %v1164_v7, %s4221_s29  ;;  %2109 = vrot.lane.b32.xlu0 %v2065_v36, %s4221_s29  ;;  %v5301_v7 = vld [vmem:[%s5749_s3 + $0xe8] sm:$0xff] }
 0x183   :  { %2111 = vrot.lane.b32.xlu1 %v2066_v32, %s4221_s29  ;;  %v5314_v32 = vld [vmem:[%s5749_s3 + $0xe0] sm:$0xff] }
 0x19c   :  { %v2074_v51 = vpop.permute.xlu0 %2073 }
 0x19e   :  { %v2076_v22 = vpop.permute.xlu1 %2075 }
 0x19f   :  { %v2086_v4 = vsel %vm2085_vm2, %v2074_v51, %v2076_v22  ;;  %v5332_v22 = vld [vmem:[%s5749_s3 + $0xd8] sm:$0xff] }
 0x1a0   :  { %v2092_v37 = vmax.f32 %v5793_v20, %v2086_v4  ;;  %v5337_v4 = vld [vmem:[%s5749_s3 + $0x158] sm:$0xff] }
 0x1a2   :  { %3832 = vmatprep.mubr.msk.f32.mxu1 %vm2122_vm3, %v2092_v37  ;;  %v2286_v39 = vrot.slane %v2092_v37, 4  ;;  %v5364_v37 = vld [vmem:[%s5749_s3 + $0x148] sm:$0xff] }
 0x1e1   :  { %v2102_v31 = vpop.permute.xlu0 %2101 }
 0x1e5   :  { %v2106_v10 = vpop.permute.xlu1 %2105  ;;  %v2104_v28 = vpop.permute.xlu0 %2103 }
 0x1e6   :  { %v2113_v61 = vsel %vm2085_vm2, %v2102_v31, %v2104_v28  ;;  %v5794_v31 = vld [vmem:[#allocation11_spill] sm:$0xff]  ;;  %v5795_v28 = vld [vmem:[#allocation12_spill] sm:$0xff] }
 0x1e7   :  { %v5175_v46 = vmax.f32 %v2061_v27, %v2113_v61  ;;  %v5194_v27 = vld [vmem:[%s5749_s3 + $0xc0] sm:$0xff]  ;;  %v5383_v61 = vld [vmem:[%s5749_s3 + $0x138] sm:$0xff] }
 0x1e9   :  { %v2108_v12 = vpop.permute.xlu1 %2107  ;;  %3811 = vmatprep.mubr.msk.f32.mxu0 %vm2122_vm3, %v5175_v46  ;;  %v2078_v42 = vpop.permute.xlu0 %2077  ;;  %v2373_v53 = vrot.slane %v5175_v46, 4 }
 0x1ea   :  { %v2114_v47 = vsel %vm2085_vm2, %v2106_v10, %v2108_v12  ;;  %v5374_v10 = vld [vmem:[%s5749_s3 + $0x140] sm:$0xff]  ;;  %v5796_v12 = vld [vmem:[#allocation14_spill] sm:$0xff] }
 0x1eb   :  { %v5180_v2 = vmax.f32 %v2063_v40, %v2114_v47  ;;  %v5392_v47 = vld [vmem:[%s5749_s3 + $0x130] sm:$0xff] }
 0x1ed   :  { %v2080_v13 = vpop.permute.xlu1 %2079  ;;  %3812 = vmatmul.mubr.msk.f32.vlgmr.msra.gmra.mxu0 %vm2122_vm3, %v5180_v2  ;;  %v2374_v58 = vrot.slane %v5180_v2, 4  ;;  %v2082_v11 = vpop.permute.xlu0 %2081 }
 0x1ee   :  { %v2087_v1 = vsel %vm2085_vm2, %v2078_v42, %v2080_v13  ;;  %3836 = vmatpush3.msra.mxu0 %v5087_v38  ;;  %v5797_v42 = vld [vmem:[#allocation17_spill] sm:$0xff] }
 0x1ef   :  { %v5196_v9 = vmax.f32 %v1161_v21, %v2087_v1  ;;  %3837 = vmatprep.subr.mxu0 %v5185_v6  ;;  %v5228_v59 = vsel %vm172_vm0, %v2373_v53, %v2374_v58  ;;  %v5401_v13 = vld [vmem:[%s5749_s3 + $0x128] sm:$0xff]  ;;  %v5410_v1 = vld [vmem:[%s5749_s3 + $0x120] sm:$0xff] }
 0x1f0   :  { %3838 = vmatpush3.msra.mxu0 %v5185_v6 }
 0x1f1   :  { %3839 = vmatprep.subr.mxu0 %v5194_v27  ;;  %v2084_v40 = vpop.permute.xlu1 %2083  ;;  %3833 = vmatmul.mubr.msk.f32.vlgmr.msra.gmra.mxu1 %vm2122_vm3, %v5196_v9  ;;  %v2287_v43 = vrot.slane %v5196_v9, 4  ;;  %v2110_v62 = vpop.permute.xlu0 %2109 }
 0x1f2   :  { %3840 = vmatpush3.msra.mxu0 %v5194_v27  ;;  %3857 = vmatpush3.msra.mxu1 %v5127_v49  ;;  %v2088_v44 = vsel %vm2085_vm2, %v2082_v11, %v2084_v40 }
 0x1f3   :  { %3841 = vmatprep.subr.mxu0 %v5204_v14  ;;  %3858 = vmatprep.subr.mxu1 %v5209_v18  ;;  %v5231_v21 = vsel %vm172_vm0, %v2286_v39, %v2287_v43  ;;  %v5259_v15 = vmax.f32 %v1163_v3, %v2088_v44  ;;  %v5286_v3 = vld [vmem:[%s5749_s3 + $0xf0] sm:$0xff]  ;;  %s4224_s3 = smov [#allocation7]  }
 0x1f4   :  { %3874 = vmatprep.mubr.msk.f32.mxu1 %vm2122_vm3, %v5228_v59  ;;  %3842 = vmatpush3.msra.mxu0 %v5204_v14  ;;  %v2953_v44 = vld [vmem:[%s5751_s5 + $0x50] sm:$0xff]  ;;  %s3478_s17 = sshll.u32 %s4224_s3, 4  ;;  %s3479_s17 = int_to_ptr.vmem [resolvable:$true] %s3478_s17 }
 0x1f5   :  { %3859 = vmatpush3.msra.mxu1 %v5209_v18  ;;  %3843 = vmatprep.subr.mxu0 %v5221_v0  ;;  %v2112_v5 = vpop.permute.xlu1 %2111  ;;  %v2289_v16 = vrot.slane %v5259_v15, 4  ;;  %s4188_s18 = scalar_lea.vmem %s3479_s17, 64  ;;  %p4193_p11 = scmp.lt.s32.totalorder %s3479_s17, %s3479_s17 }
 0x1f6   :  { %3853 = vmatprep.mubr.msk.f32.mxu0 %vm2122_vm3, %v5231_v21  ;;  %3860 = vmatprep.subr.mxu1 %v5236_v50  ;;  %v2115_v60 = vsel %vm2085_vm2, %v2110_v62, %v2112_v5  ;;  %p4189_p10 = scmp.ne.s32.totalorder %s3479_s17, %s4188_s18  ;;  %p4194_p12 = scmp.lt.s32.totalorder %s4188_s18, %s4188_s18 }
 0x1f7   :  { %3844 = vmatpush3.msra.mxu0 %v5221_v0  ;;  %3861 = vmatpush3.msra.mxu1 %v5236_v50  ;;  %v5305_v41 = vmax.f32 %v2065_v36, %v2115_v60  ;;  %v2290_v36 = vsel %vm172_vm0, %v2287_v43, %v2289_v16  ;;  %v2952_v60 = vld [vmem:[%s5751_s5 + $0x48] sm:$0xff] }
 0x1f8   :  { %3845 = vmatprep.subr.mxu0 %v5247_v57  ;;  %3862 = vmatprep.subr.mxu1 %v5252_v45  ;;  %p4195_p13 = por %p4194_p12, %p4193_p11 }
 0x1f9   :  { %3846 = vmatpush3.msra.mxu0 %v5247_v57  ;;  %3863 = vmatpush3.msra.mxu1 %v5252_v45  ;;  %v2376_v51 = vrot.slane %v5305_v41, 4 }
 0x1fa   :  { %3847 = vmatprep.subr.mxu0 %v5266_v24  ;;  %3864 = vmatprep.subr.mxu1 %v5271_v26  ;;  %p4196_p0 = pnand %p4195_p13, %p4189_p10 }
 0x1fb   :  { %3848 = vmatpush3.msra.mxu0 %v5266_v24  ;;  %3865 = vmatpush3.msra.mxu1 %v5271_v26  ;;  %v5356_v20 = vsel %vm172_vm0, %v2374_v58, %v2376_v51 }
 0x1fc   :  { %3849 = vmatprep.subr.mxu0 %v5281_v34  ;;  %3866 = vmatprep.subr.mxu1 %v5286_v3 }
 0x1fd   :  { %3850 = vmatpush3.msra.mxu0 %v5281_v34  ;;  %3867 = vmatpush3.msra.mxu1 %v5286_v3 }
 0x1fe   :  { %3851 = vmatprep.subr.mxu0 %v5296_v54  ;;  %3868 = vmatprep.subr.mxu1 %v5301_v7 }
 0x1ff   :  { %3852 = vmatpush3.msra.mxu0 %v5296_v54  ;;  %3869 = vmatpush3.msra.mxu1 %v5301_v7 }
 0x200   :  { %3854 = vmatmul.mubr.msk.f32.vlgmr.msra.gmra.mxu0 %vm2122_vm3, %v2290_v36  ;;  %3870 = vmatprep.subr.mxu1 %v5314_v32 }
 0x201   :  { %3877 = vmatprep.subr.mxu0 %v5321_v19  ;;  %3871 = vmatpush3.msra.mxu1 %v5314_v32 }
 0x202   :  { %3878 = vmatpush3.msra.mxu0 %v5321_v19  ;;  %3895 = vmatprep.mubr.msk.f32.mxu0 %vm2122_vm3, %v5196_v9 }
 0x203   :  { %3872 = vmatprep.subr.mxu1 %v5332_v22  ;;  %3879 = vmatprep.subr.mxu0 %v5337_v4 }
 0x204   :  { %3873 = vmatpush3.msra.mxu1 %v5332_v22  ;;  %3880 = vmatpush3.msra.mxu0 %v5337_v4 }
 0x205   :  { %3875 = vmatmul.mubr.msk.f32.vlgmr.msra.gmra.mxu1 %vm2122_vm3, %v5356_v20  ;;  %3881 = vmatprep.subr.mxu0 %v5347_v33 }
 0x206   :  { %3898 = vmatprep.subr.mxu1 %v5794_v31  ;;  %3882 = vmatpush3.msra.mxu0 %v5347_v33 }
 0x207   :  { %3899 = vmatpush3.msra.mxu1 %v5794_v31  ;;  %3916 = vmatprep.mubr.msk.f32.mxu1 %vm2122_vm3, %v5231_v21 }
 0x208   :  { %3883 = vmatprep.subr.mxu0 %v5364_v37  ;;  %3900 = vmatprep.subr.mxu1 %v5795_v28 }
 0x209   :  { %3884 = vmatpush3.msra.mxu0 %v5364_v37  ;;  %3901 = vmatpush3.msra.mxu1 %v5795_v28 }
 0x20a   :  { %3885 = vmatprep.subr.mxu0 %v5374_v10  ;;  %3902 = vmatprep.subr.mxu1 %v5796_v12 }
 0x20b   :  { %3886 = vmatpush3.msra.mxu0 %v5374_v10  ;;  %3903 = vmatpush3.msra.mxu1 %v5796_v12 }
 0x20c   :  { %3887 = vmatprep.subr.mxu0 %v5383_v61  ;;  %3904 = vmatprep.subr.mxu1 %v5797_v42 }
 0x20d   :  { %3888 = vmatpush3.msra.mxu0 %v5383_v61  ;;  %3905 = vmatpush3.msra.mxu1 %v5797_v42 }
 0x20e   :  { %3889 = vmatprep.subr.mxu0 %v5392_v47  ;;  %3906 = vmatprep.subr.mxu1 %v5006_v52 }
 0x20f   :  { %3890 = vmatpush3.msra.mxu0 %v5392_v47  ;;  %3907 = vmatpush3.msra.mxu1 %v5006_v52  ;;  %v5798_v52 = vld [vmem:[#allocation13_spill] sm:$0xff] }
 0x210   :  { %3891 = vmatprep.subr.mxu0 %v5401_v13  ;;  %3908 = vmatprep.subr.mxu1 %v5016_v23 }
 0x211   :  { %3892 = vmatpush3.msra.mxu0 %v5401_v13  ;;  %3909 = vmatpush3.msra.mxu1 %v5016_v23  ;;  %v5799_v23 = vld [vmem:[#allocation15_spill] sm:$0xff] }
 0x212   :  { %3893 = vmatprep.subr.mxu0 %v5410_v1  ;;  %3910 = vmatprep.subr.mxu1 %v5039_v56 }
 0x213   :  { %3894 = vmatpush3.msra.mxu0 %v5410_v1  ;;  %3911 = vmatpush3.msra.mxu1 %v5039_v56  ;;  %v2958_v56 = vld [vmem:[%s5751_s5 + $0x78] sm:$0xff] }
 0x214   :  { %3896 = vmatmul.mubr.msk.f32.vlgmr.msra.gmra.mxu0 %vm2122_vm3, %v5259_v15  ;;  %3912 = vmatprep.subr.mxu1 %v5055_v30 }
 0x215   :  { %3919 = vmatprep.subr.mxu0 %v5798_v52  ;;  %3913 = vmatpush3.msra.mxu1 %v5055_v30  ;;  %v2957_v30 = vld [vmem:[%s5751_s5 + $0x70] sm:$0xff] }
 0x216   :  { %3920 = vmatpush3.msra.mxu0 %v5798_v52  ;;  %3937 = vmatprep.mubr.msk.f32.mxu0 %vm2122_vm3, %v5175_v46  ;;  %v2974_v52 = vld [vmem:[%s5751_s5 + $0xf8] sm:$0xff] }
 0x217   :  { %3914 = vmatprep.subr.mxu1 %v5073_v29  ;;  %3921 = vmatprep.subr.mxu0 %v5799_v23 }
 0x218   :  { %3915 = vmatpush3.msra.mxu1 %v5073_v29  ;;  %3922 = vmatpush3.msra.mxu0 %v5799_v23  ;;  %v2956_v29 = vld [vmem:[%s5751_s5 + $0x68] sm:$0xff] }
 0x219   :  { %3917 = vmatmul.mubr.msk.f32.vlgmr.msra.gmra.mxu1 %vm2122_vm3, %v2290_v36  ;;  %3923 = vmatprep.subr.mxu0 %v5011_v55 }
 0x21a   :  { %3940 = vmatprep.subr.mxu1 %v5087_v38  ;;  %3924 = vmatpush3.msra.mxu0 %v5011_v55  ;;  %v5800_v55 = vmov 0.0  }
 0x21b   :  { %3941 = vmatpush3.msra.mxu1 %v5087_v38  ;;  %3958 = vmatprep.mubr.msk.f32.mxu1 %vm2122_vm3, %v5228_v59  ;;  %v2955_v38 = vld [vmem:[%s5751_s5 + $0x60] sm:$0xff] }
 0x21c   :  { %3925 = vmatprep.subr.mxu0 %v5023_v35  ;;  %3942 = vmatprep.subr.mxu1 %v5185_v6 }
 0x21d   :  { %3926 = vmatpush3.msra.mxu0 %v5023_v35  ;;  %3943 = vmatpush3.msra.mxu1 %v5185_v6  ;;  %v2950_v35 = vld [vmem:[%s5751_s5 + $0x38] sm:$0xff] }
 0x21e   :  { %3927 = vmatprep.subr.mxu0 %v5044_v17  ;;  %3944 = vmatprep.subr.mxu1 %v5194_v27 }
 0x21f   :  { %3928 = vmatpush3.msra.mxu0 %v5044_v17  ;;  %3945 = vmatpush3.msra.mxu1 %v5194_v27  ;;  %v2949_v17 = vld [vmem:[%s5751_s5 + $0x30] sm:$0xff] }
 0x220   :  { %3929 = vmatprep.subr.mxu0 %v5060_v25  ;;  %3946 = vmatprep.subr.mxu1 %v5204_v14 }
 0x221   :  { %3930 = vmatpush3.msra.mxu0 %v5060_v25  ;;  %3947 = vmatpush3.msra.mxu1 %v5204_v14  ;;  %v2948_v25 = vld [vmem:[%s5751_s5 + $0x28] sm:$0xff] }
 0x222   :  { %3931 = vmatprep.subr.mxu0 %v5078_v63  ;;  %3948 = vmatprep.subr.mxu1 %v5221_v0 }
 0x223   :  { %3932 = vmatpush3.msra.mxu0 %v5078_v63  ;;  %3949 = vmatpush3.msra.mxu1 %v5221_v0  ;;  %v2947_v63 = vld [vmem:[%s5751_s5 + $0x20] sm:$0xff] }
 0x224   :  { %3933 = vmatprep.subr.mxu0 %v5095_v48  ;;  %3950 = vmatprep.subr.mxu1 %v5247_v57 }
 0x225   :  { %3934 = vmatpush3.msra.mxu0 %v5095_v48  ;;  %3951 = vmatpush3.msra.mxu1 %v5247_v57  ;;  %v2946_v48 = vld [vmem:[%s5751_s5 + $0x18] sm:$0xff]  ;;  %v2944_v57 = vld [vmem:[%s5751_s5 + $0x8] sm:$0xff] }
 0x226   :  { %3935 = vmatprep.subr.mxu0 %v5110_v8  ;;  %3952 = vmatprep.subr.mxu1 %v5266_v24 }
 0x227   :  { %3936 = vmatpush3.msra.mxu0 %v5110_v8  ;;  %3953 = vmatpush3.msra.mxu1 %v5266_v24  ;;  %v2954_v8 = vld [vmem:[%s5751_s5 + $0x58] sm:$0xff] }
 0x228   :  { %3938 = vmatmul.mubr.msk.f32.vlgmr.msra.gmra.mxu0 %vm2122_vm3, %v5180_v2  ;;  %3954 = vmatprep.subr.mxu1 %v5281_v34 }
 0x229   :  { %3961 = vmatprep.subr.mxu0 %v5127_v49  ;;  %3955 = vmatpush3.msra.mxu1 %v5281_v34  ;;  %v2943_v34 = vld [vmem:[%s5751_s5] sm:$0xff] }
 0x22a   :  { %3962 = vmatpush3.msra.mxu0 %v5127_v49  ;;  %3979 = vmatprep.mubr.msk.f32.mxu0 %vm2122_vm3, %v5196_v9  ;;  %v2945_v49 = vld [vmem:[%s5751_s5 + $0x10] sm:$0xff] }
 0x22b   :  { %3956 = vmatprep.subr.mxu1 %v5296_v54  ;;  %3963 = vmatprep.subr.mxu0 %v5209_v18 }
 0x22c   :  { %3957 = vmatpush3.msra.mxu1 %v5296_v54  ;;  %3964 = vmatpush3.msra.mxu0 %v5209_v18 }
 0x22d   :  { %3959 = vmatmul.mubr.msk.f32.vlgmr.msra.gmra.mxu1 %vm2122_vm3, %v5356_v20  ;;  %3965 = vmatprep.subr.mxu0 %v5236_v50  ;;  %v3608_v20 = vld [vmem:[%s5750_s4] ss:$0 sm:$0xff] }
 0x22e   :  { %3982 = vmatprep.subr.mxu1 %v5321_v19  ;;  %3966 = vmatpush3.msra.mxu0 %v5236_v50 }
 0x22f   :  { %3983 = vmatpush3.msra.mxu1 %v5321_v19  ;;  %4000 = vmatprep.mubr.msk.f32.mxu1 %vm2122_vm3, %v5180_v2 }
 0x230   :  { %3967 = vmatprep.subr.mxu0 %v5252_v45  ;;  %3984 = vmatprep.subr.mxu1 %v5337_v4 }
 0x231   :  { %3968 = vmatpush3.msra.mxu0 %v5252_v45  ;;  %3985 = vmatpush3.msra.mxu1 %v5337_v4 }
 0x232   :  { %3969 = vmatprep.subr.mxu0 %v5271_v26  ;;  %3986 = vmatprep.subr.mxu1 %v5347_v33 }
 0x233   :  { %3970 = vmatpush3.msra.mxu0 %v5271_v26  ;;  %3987 = vmatpush3.msra.mxu1 %v5347_v33 }
 0x234   :  { %3971 = vmatprep.subr.mxu0 %v5286_v3  ;;  %3988 = vmatprep.subr.mxu1 %v5364_v37 }
 0x235   :  { %3972 = vmatpush3.msra.mxu0 %v5286_v3  ;;  %3989 = vmatpush3.msra.mxu1 %v5364_v37 }
 0x236   :  { %3973 = vmatprep.subr.mxu0 %v5301_v7  ;;  %3990 = vmatprep.subr.mxu1 %v5374_v10 }
 0x237   :  { %3974 = vmatpush3.msra.mxu0 %v5301_v7  ;;  %3991 = vmatpush3.msra.mxu1 %v5374_v10 }
 0x238   :  { %3975 = vmatprep.subr.mxu0 %v5314_v32  ;;  %3992 = vmatprep.subr.mxu1 %v5383_v61 }
 0x239   :  { %3976 = vmatpush3.msra.mxu0 %v5314_v32  ;;  %3993 = vmatpush3.msra.mxu1 %v5383_v61  ;;  %v2951_v32 = vld [vmem:[%s5751_s5 + $0x40] sm:$0xff] }
 0x23a   :  { %3977 = vmatprep.subr.mxu0 %v5332_v22  ;;  %3994 = vmatprep.subr.mxu1 %v5392_v47 }
 0x23b   :  { %3978 = vmatpush3.msra.mxu0 %v5332_v22  ;;  %3995 = vmatpush3.msra.mxu1 %v5392_v47 }
 0x23c   :  { %3980 = vmatmul.mubr.msk.f32.vlgmr.msra.gmra.mxu0 %vm2122_vm3, %v5259_v15  ;;  %3996 = vmatprep.subr.mxu1 %v5401_v13 }
 0x23d   :  { %3997 = vmatpush3.msra.mxu1 %v5401_v13  ;;  %4003 = vmatprep.subr.mxu0 %v5800_v55 }
 0x23e   :  { %3998 = vmatprep.subr.mxu1 %v5410_v1  ;;  %4004 = vmatpush3.msra.mxu0 %v2958_v56  ;;  %v2973_v56 = vld [vmem:[%s5751_s5 + $0xf0] sm:$0xff] }
 0x23f   :  { %3999 = vmatpush3.msra.mxu1 %v5410_v1  ;;  %4005 = vmatprep.subr.mxu0 %v5800_v55 }
 0x240   :  { %4001 = vmatmul.mubr.msk.f32.vlgmr.msra.gmra.mxu1 %vm2122_vm3, %v5305_v41  ;;  %4022 = vmatprep.subr.mxu1 %v5800_v55 }
 0x241   :  { %4023 = vmatpush3.msra.mxu1 %v2950_v35  ;;  %4006 = vmatpush3.msra.mxu0 %v2957_v30  ;;  %v2966_v35 = vld [vmem:[%s5751_s5 + $0xb8] sm:$0xff]  ;;  %v2972_v30 = vld [vmem:[%s5751_s5 + $0xe8] sm:$0xff] }
 0x242   :  { %4024 = vmatprep.subr.mxu1 %v5800_v55  ;;  %4007 = vmatprep.subr.mxu0 %v5800_v55 }
 0x243   :  { %4025 = vmatpush3.msra.mxu1 %v2949_v17  ;;  %4008 = vmatpush3.msra.mxu0 %v2956_v29  ;;  %v2965_v17 = vld [vmem:[%s5751_s5 + $0xb0] sm:$0xff]  ;;  %v2971_v29 = vld [vmem:[%s5751_s5 + $0xe0] sm:$0xff] }
 0x244   :  { %4026 = vmatprep.subr.mxu1 %v5800_v55  ;;  %4009 = vmatprep.subr.mxu0 %v5800_v55 }
 0x245   :  { %4027 = vmatpush3.msra.mxu1 %v2948_v25  ;;  %4010 = vmatpush3.msra.mxu0 %v2955_v38  ;;  %v2964_v25 = vld [vmem:[%s5751_s5 + $0xa8] sm:$0xff]  ;;  %v2970_v38 = vld [vmem:[%s5751_s5 + $0xd8] sm:$0xff] }
 0x246   :  { %4028 = vmatprep.subr.mxu1 %v5800_v55  ;;  %4011 = vmatprep.subr.mxu0 %v5800_v55 }
 0x247   :  { %4029 = vmatpush3.msra.mxu1 %v2947_v63  ;;  %4012 = vmatpush3.msra.mxu0 %v2954_v8  ;;  %v2963_v63 = vld [vmem:[%s5751_s5 + $0xa0] sm:$0xff]  ;;  %v2962_v8 = vld [vmem:[%s5751_s5 + $0x98] sm:$0xff] }
 0x248   :  { %4030 = vmatprep.subr.mxu1 %v5800_v55  ;;  %4013 = vmatprep.subr.mxu0 %v5800_v55 }
 0x249   :  { %4031 = vmatpush3.msra.mxu1 %v2946_v48  ;;  %4014 = vmatpush3.msra.mxu0 %v2953_v44  ;;  %v3283_v44 = vld [vmem:[%s5753_s7 + $0x20] sm:$0xff] }
 0x24a   :  { %4032 = vmatprep.subr.mxu1 %v5800_v55  ;;  %4015 = vmatprep.subr.mxu0 %v5800_v55 }
 0x24b   :  { %4033 = vmatpush3.msra.mxu1 %v2945_v49  ;;  %4016 = vmatpush3.msra.mxu0 %v2952_v60  ;;  %v2969_v49 = vld [vmem:[%s5751_s5 + $0xd0] sm:$0xff]  ;;  %v3383_v60 = vld [vmem:[#allocation5 + $0x38] sm:$0xff] }
 0x24c   :  { %4034 = vmatprep.subr.mxu1 %v5800_v55  ;;  %4017 = vmatprep.subr.mxu0 %v5800_v55 }
 0x24d   :  { %4035 = vmatpush3.msra.mxu1 %v2944_v57  ;;  %4038 = vmatprep.mubr.msk.f32.mxu1 %vm4222_vm4, %v5800_v55  ;;  %v3282_v57 = vld [vmem:[%s5753_s7 + $0x18] sm:$0xff] }
 0x24e   :  { %4036 = vmatprep.subr.mxu1 %v5800_v55  ;;  %4018 = vmatpush3.msra.mxu0 %v2951_v32 }
 0x24f   :  { %4037 = vmatpush3.msra.mxu1 %v2943_v34  ;;  %4019 = vmatprep.mubr.msk.f32.mxu0 %vm4222_vm4, %v5800_v55  ;;  %v3382_v34 = vld [vmem:[#allocation5 + $0x30] sm:$0xff] }
 0x250   :  { %4060 = vmatprep.subr.mxu1 %v5800_v55  ;;  %4041 = vmatprep.subr.mxu0 %v5800_v55 }
 0x2ad   :  { %v3813_v46 = vpop.f32.mrf.mxu0 }
 0x2af   :  { %v2195_v6 = vpop.f32.mrf.mxu0 }
 0x2b1   :  { %v3834_v2 = vpop.f32.mrf.mxu1 }
 0x2b2   :  { %v2282_v21 = vadd.f32 %v3834_v2, %v3813_v46  ;;  %v2961_v2 = vld [vmem:[%s5751_s5 + $0x90] sm:$0xff] }
 0x2b3   :  { %v2276_v27 = vpop.f32.mrf.mxu1 }
 0x2b4   :  { %v2277_v45 = vadd.f32 %v2276_v27, %v2195_v6  ;;  %v2968_v6 = vld [vmem:[%s5751_s5 + $0xc8] sm:$0xff] }
 0x2b5   :  { %v2960_v27 = vld [vmem:[%s5751_s5 + $0x88] sm:$0xff] }
 0x2c0   :  { %v3855_v9 = vpop.f32.mrf.mxu0 }
 0x2c1   :  { %v2371_v24 = vadd.f32 %v3855_v9, %v2282_v21  ;;  %v2967_v9 = vld [vmem:[%s5751_s5 + $0xc0] sm:$0xff]  ;;  %v3285_v21 = vld [vmem:[%s5753_s7 + $0x30] sm:$0xff] }
 0x2c2   :  { %v2361_v14 = vpop.f32.mrf.mxu0 }
 0x2c3   :  { %v2370_v3 = vadd.f32 %v2361_v14, %v2277_v45  ;;  %v2959_v14 = vld [vmem:[%s5751_s5 + $0x80] sm:$0xff]  ;;  %v3281_v45 = vld [vmem:[%s5753_s7 + $0x10] sm:$0xff] }
 0x2c5   :  { %v3876_v58 = vpop.f32.mrf.mxu1 }
 0x2c6   :  { %v2458_v54 = vadd.f32 %v3876_v58, %v2371_v24  ;;  %v3386_v24 = vld [vmem:[#allocation5 + $0x50] sm:$0xf] }
 0x2c7   :  { %v2448_v18 = vpop.f32.mrf.mxu1 }
 0x2c8   :  { %v2457_v19 = vadd.f32 %v2448_v18, %v2370_v3  ;;  %v3293_v18 = vld [vmem:[%s5753_s7 + $0x70] sm:$0xff]  ;;  %v3381_v3 = vld [vmem:[#allocation5 + $0x28] sm:$0xff] }
 0x2d4   :  { %v3897_v39 = vpop.f32.mrf.mxu0 }
 0x2d5   :  { %v2537_v51 = vadd.f32 %v3897_v39, %v2458_v54  ;;  %v3292_v39 = vld [vmem:[%s5753_s7 + $0x68] sm:$0xff]  ;;  %v3379_v54 = vld [vmem:[#allocation5 + $0x18] sm:$0xff] }
 0x2d6   :  { %v2527_v40 = vpop.f32.mrf.mxu0 }
 0x2d7   :  { %v2536_v37 = vadd.f32 %v2527_v40, %v2457_v19  ;;  %v3290_v40 = vld [vmem:[%s5753_s7 + $0x58] sm:$0xff] }
 0x2d9   :  { %v3918_v53 = vpop.f32.mrf.mxu1 }
 0x2db   :  { %v2604_v43 = vpop.f32.mrf.mxu1 }
 0x2e8   :  { %v3939_v11 = vpop.f32.mrf.mxu0 }
 0x2e9   :  { %v2685_v50 = vadd.f32 %v3939_v11, %v3918_v53  ;;  %v3291_v53 = vld [vmem:[%s5753_s7 + $0x60] sm:$0xff]  ;;  %v3288_v11 = vld [vmem:[%s5753_s7 + $0x48] sm:$0xff] }
 0x2ea   :  { %v2679_v59 = vpop.f32.mrf.mxu0 }
 0x2eb   :  { %v2680_v26 = vadd.f32 %v2679_v59, %v2604_v43  ;;  %v3289_v43 = vld [vmem:[%s5753_s7 + $0x50] sm:$0xff]  ;;  %v3286_v59 = vld [vmem:[%s5753_s7 + $0x38] sm:$0xff] }
 0x2ed   :  { %v3960_v0 = vpop.f32.mrf.mxu1 }
 0x2ee   :  { %v2764_v62 = vadd.f32 %v3960_v0, %v2685_v50  ;;  %v3287_v0 = vld [vmem:[%s5753_s7 + $0x40] sm:$0xff]  ;;  %v3284_v50 = vld [vmem:[%s5753_s7 + $0x28] sm:$0xff] }
 0x2ef   :  { %v2754_v5 = vpop.f32.mrf.mxu1 }
 0x2f0   :  { %v2763_v7 = vadd.f32 %v2754_v5, %v2680_v26  ;;  %v3280_v5 = vld [vmem:[%s5753_s7 + $0x8] sm:$0xff] }
 0x2f1   :  { %v3385_v26 = vld [vmem:[#allocation5 + $0x48] sm:$0xff] }
 0x2fc   :  { %v3981_v15 = vpop.f32.mrf.mxu0 }
 0x2fd   :  { %v2841_v41 = vadd.f32 %v3981_v15, %v2764_v62  ;;  %v3279_v15 = vld [vmem:[%s5753_s7] sm:$0xff] }
 0x2fe   :  { %v2831_v16 = vpop.f32.mrf.mxu0  ;;  %v3384_v62 = vld [vmem:[#allocation5 + $0x40] sm:$0xff] }
 0x2ff   :  { %v2840_v22 = vadd.f32 %v2831_v16, %v2763_v7  ;;  %v3380_v16 = vld [vmem:[#allocation5 + $0x20] sm:$0xff] }
 0x300   :  { %v4002_v36 = vpop.f32.mrf.mxu1 }
 0x301   :  { %v2920_v4 = vadd.f32 %v4002_v36, %v2841_v41 }
 0x302   :  { %v2910_v33 = vpop.f32.mrf.mxu1 }
 0x303   :  { %v2922_v31 = vmax.f32 %v2537_v51, %v2920_v4  ;;  %v2919_v10 = vadd.f32 %v2910_v33, %v2840_v22 }
 0x305   :  { %v2921_v28 = vmax.f32 %v2536_v37, %v2919_v10  ;;  %v2930_v61 = vadd.f32 %v3608_v20, %v2922_v31 }
 0x307   :  { %v2932_v12 = vmax.f32 %v2930_v61, 0.0  ;;  %v2929_v47 = vadd.f32 %v3608_v20, %v2921_v28  ;;  %v3613_v20 = vld [vmem:[%s5752_s6] ss:$0 sm:$0xff]  ;;  %v3378_v61 = vld [vmem:[#allocation5 + $0x10] sm:$0xff] }
 0x309   :  { %2937 = vrot.lane.b32.xlu1 %v2932_v12, %s4223_s25  ;;  %v2931_v42 = vmax.f32 %v2929_v47, 0.0  ;;  %v3376_v47 = vld [vmem:[#allocation5] sm:$0xff] }
 0x30b   :  { %2935 = vrot.lane.b32.xlu0 %v2931_v42, %s4223_s25 }
 0x37b   :  { %v2938_v48 = vpop.permute.xlu1 %2937 }
 0x37c   :  { %v2942_v46 = vmax.f32 %v2932_v12, %v2938_v48  ;;  %v3377_v12 = vld [vmem:[#allocation5 + $0x8] sm:$0xff] }
 0x37d   :  { %v2936_v13 = vpop.permute.xlu0 %2935 }
 0x37e   :  { %v2941_v1 = vmax.f32 %v2931_v42, %v2936_v13  ;;  %v3196_v58 = vrot.slane %v2942_v46, 4  ;;  %v3614_v42 = vld [vmem:[%s5754_s8] ss:$0 sm:$0xff] }
 0x380   :  { %v2976_v23 = vrot.slane %v2941_v1, 4  ;;  %4039 = vmatmul.mubr.msk.f32.vlgmr.msra.gmra.mxu1 %vm2977_vm5, %v2941_v1 }
 0x381   :  { %4061 = vmatpush3.msra.mxu1 %v2974_v52  ;;  %4076 = vmatprep.mubr.msk.f32.mxu1 %vm4222_vm4, %v5800_v55 }
 0x382   :  { %4062 = vmatprep.subr.mxu1 %v5800_v55  ;;  %4020 = vmatmul.mubr.msk.f32.vlgmr.msra.gmra.mxu0 %vm2977_vm5, %v2976_v23 }
 0x383   :  { %4042 = vmatpush3.msra.mxu0 %v2966_v35  ;;  %4063 = vmatpush3.msra.mxu1 %v2973_v56  ;;  %v3616_v35 = vld [vmem:[%s5756_s10] ss:$0 sm:$0xff] }
 0x384   :  { %4043 = vmatprep.subr.mxu0 %v5800_v55  ;;  %4064 = vmatprep.subr.mxu1 %v5800_v55 }
 0x385   :  { %4044 = vmatpush3.msra.mxu0 %v2965_v17  ;;  %4065 = vmatpush3.msra.mxu1 %v2972_v30 }
 0x386   :  { %4045 = vmatprep.subr.mxu0 %v5800_v55  ;;  %4066 = vmatprep.subr.mxu1 %v5800_v55 }
 0x387   :  { %4046 = vmatpush3.msra.mxu0 %v2964_v25  ;;  %4067 = vmatpush3.msra.mxu1 %v2971_v29 }
 0x388   :  { %4047 = vmatprep.subr.mxu0 %v5800_v55  ;;  %4068 = vmatprep.subr.mxu1 %v5800_v55 }
 0x389   :  { %4048 = vmatpush3.msra.mxu0 %v2963_v63  ;;  %4069 = vmatpush3.msra.mxu1 %v2970_v38 }
 0x38a   :  { %4049 = vmatprep.subr.mxu0 %v5800_v55  ;;  %4070 = vmatprep.subr.mxu1 %v5800_v55 }
 0x38b   :  { %4050 = vmatpush3.msra.mxu0 %v2962_v8  ;;  %4071 = vmatpush3.msra.mxu1 %v2969_v49 }
 0x38c   :  { %4051 = vmatprep.subr.mxu0 %v5800_v55  ;;  %4072 = vmatprep.subr.mxu1 %v5800_v55 }
 0x38d   :  { %4052 = vmatpush3.msra.mxu0 %v2961_v2  ;;  %4073 = vmatpush3.msra.mxu1 %v2968_v6 }
 0x38e   :  { %4053 = vmatprep.subr.mxu0 %v5800_v55  ;;  %4074 = vmatprep.subr.mxu1 %v5800_v55 }
 0x38f   :  { %4054 = vmatpush3.msra.mxu0 %v2960_v27  ;;  %4075 = vmatpush3.msra.mxu1 %v2967_v9 }
 0x390   :  { %4055 = vmatprep.subr.mxu0 %v5800_v55  ;;  %4077 = vmatmul.mubr.msk.f32.vlgmr.msra.gmra.mxu1 %vm2977_vm5, %v3196_v58 }
 0x391   :  { %4056 = vmatpush3.msra.mxu0 %v2959_v14  ;;  %4057 = vmatprep.mubr.msk.f32.mxu0 %vm4222_vm4, %v5800_v55 }
 0x392   :  { %4058 = vmatmul.mubr.msk.f32.vlgmr.msra.gmra.mxu0 %vm2977_vm5, %v2942_v46  ;;  %4079 = vmatprep.subr.mxu0 %v5800_v55 }
 0x393   :  { %4080 = vmatpush3.msra.mxu0 %v3293_v18  ;;  %4109 = vmatprep.mubr.msk.f32.mxu0 %vm4222_vm4, %v5800_v55 }
 0x394   :  { %4081 = vmatprep.subr.mxu0 %v5800_v55  ;;  %4112 = vmatprep.subr.mxu1 %v5800_v55 }
 0x395   :  { %4082 = vmatpush3.msra.mxu0 %v3292_v39  ;;  %4134 = vmatprep.mubr.msk.f32.mxu1 %vm4222_vm4, %v5800_v55 }
 0x396   :  { %4083 = vmatprep.subr.mxu0 %v5800_v55  ;;  %4113 = vmatpush3.msk.msra.mxu1 %vm172_vm0, %v3386_v24 }
 0x397   :  { %4084 = vmatpush3.msra.mxu0 %v3291_v53  ;;  %4114 = vmatprep.subr.mxu1 %v5800_v55 }
 0x398   :  { %4085 = vmatprep.subr.mxu0 %v5800_v55  ;;  %4115 = vmatpush3.msra.mxu1 %v3385_v26 }
 0x399   :  { %4086 = vmatpush3.msra.mxu0 %v3290_v40  ;;  %4116 = vmatprep.subr.mxu1 %v5800_v55 }
 0x39a   :  { %4087 = vmatprep.subr.mxu0 %v5800_v55  ;;  %4117 = vmatpush3.msra.mxu1 %v3384_v62 }
 0x39b   :  { %4088 = vmatpush3.msra.mxu0 %v3289_v43  ;;  %4118 = vmatprep.subr.mxu1 %v5800_v55 }
 0x39c   :  { %4089 = vmatprep.subr.mxu0 %v5800_v55  ;;  %4119 = vmatpush3.msra.mxu1 %v3383_v60 }
 0x39d   :  { %4090 = vmatpush3.msra.mxu0 %v3288_v11  ;;  %4120 = vmatprep.subr.mxu1 %v5800_v55 }
 0x39e   :  { %4091 = vmatprep.subr.mxu0 %v5800_v55  ;;  %4121 = vmatpush3.msra.mxu1 %v3382_v34 }
 0x39f   :  { %4092 = vmatpush3.msra.mxu0 %v3287_v0  ;;  %4122 = vmatprep.subr.mxu1 %v5800_v55 }
 0x3a0   :  { %4093 = vmatprep.subr.mxu0 %v5800_v55  ;;  %4123 = vmatpush3.msra.mxu1 %v3381_v3 }
 0x3a1   :  { %4094 = vmatpush3.msra.mxu0 %v3286_v59  ;;  %4124 = vmatprep.subr.mxu1 %v5800_v55 }
 0x3a2   :  { %4095 = vmatprep.subr.mxu0 %v5800_v55  ;;  %4125 = vmatpush3.msra.mxu1 %v3380_v16 }
 0x3a3   :  { %4096 = vmatpush3.msra.mxu0 %v3285_v21  ;;  %4126 = vmatprep.subr.mxu1 %v5800_v55 }
 0x3a4   :  { %4097 = vmatprep.subr.mxu0 %v5800_v55  ;;  %4127 = vmatpush3.msra.mxu1 %v3379_v54 }
 0x3a5   :  { %4098 = vmatpush3.msra.mxu0 %v3284_v50  ;;  %4128 = vmatprep.subr.mxu1 %v5800_v55 }
 0x3a6   :  { %4099 = vmatprep.subr.mxu0 %v5800_v55  ;;  %4129 = vmatpush3.msra.mxu1 %v3378_v61 }
 0x3a7   :  { %4100 = vmatpush3.msra.mxu0 %v3283_v44  ;;  %4130 = vmatprep.subr.mxu1 %v5800_v55 }
 0x3a8   :  { %4101 = vmatprep.subr.mxu0 %v5800_v55  ;;  %4131 = vmatpush3.msra.mxu1 %v3377_v12 }
 0x3a9   :  { %4102 = vmatpush3.msra.mxu0 %v3282_v57  ;;  %4132 = vmatprep.subr.mxu1 %v5800_v55 }
 0x3aa   :  { %4103 = vmatprep.subr.mxu0 %v5800_v55  ;;  %4133 = vmatpush3.msra.mxu1 %v3376_v47 }
 0x3ab   :  { %4104 = vmatpush3.msra.mxu0 %v3281_v45 }
 0x3ac   :  { %4105 = vmatprep.subr.mxu0 %v5800_v55 }
 0x3ad   :  { %4106 = vmatpush3.msra.mxu0 %v3280_v5 }
 0x3ae   :  { %4107 = vmatprep.subr.mxu0 %v5800_v55 }
 0x3af   :  { %4108 = vmatpush3.msra.mxu0 %v3279_v15 }
 0x440   :  { %v3118_v7 = vpop.f32.mrf.mxu1 }
 0x442   :  { %v3046_v41 = vpop.f32.mrf.mxu0  ;;  %v4040_v32 = vpop.f32.mrf.mxu1 }
 0x443   :  { %v3119_v51 = vadd.f32 %v3118_v7, %v3046_v41 }
 0x444   :  { %v4021_v19 = vpop.f32.mrf.mxu0 }
 0x450   :  { %v3265_v36 = vpop.f32.mrf.mxu1 }
 0x452   :  { %v3191_v22 = vpop.f32.mrf.mxu0  ;;  %v4078_v4 = vpop.f32.mrf.mxu1 }
 0x453   :  { %v3195_v33 = vadd.f32 %v3191_v22, %v3119_v51 }
 0x454   :  { %v4059_v37 = vpop.f32.mrf.mxu0 }
 0x455   :  { %v3269_v31 = vadd.f32 %v3265_v36, %v3195_v33 }
 0x457   :  { %v3277_v10 = vadd.f32 %v3613_v20, %v3269_v31 }
 0x459   :  { %v3278_v28 = vmax.f32 %v3277_v10, 0.0 }
 0x45b   :  { %4110 = vmatmul.mubr.msk.f32.vlgmr.msra.gmra.mxu0 %vm3301_vm6, %v3278_v28 }
 0x51b   :  { %v3371_v13 = vpop.f32.mrf.mxu0 }
 0x51c   :  { %v3372_v1 = vadd.f32 %v3614_v42, %v3371_v13 }
 0x51d   :  { %v4111_v52 = vpop.f32.mrf.mxu0 }
 0x51e   :  { %v3375_v23 = vmax.f32 %v3372_v1, 0.0 }
 0x520   :  { %4135 = vmatmul.mubr.msk.f32.vlgmr.msra.gmra.mxu1 %vm3394_vm7, %v3375_v23 }
 0x5e0   :  { %v3467_v56 = vpop.f32.mrf.mxu1 }
 0x5e1   :  { %v3468_v55 = vadd.f32 %v3616_v35, %v3467_v56 }
 0x5e2   :  { %v4136_v17 = vpop.f32.mrf.mxu1 }
 0x5e3   :  { %3471 = vst [vmem:[#allocation7] sm:$0xf] %v3468_v55 }
 0x5e4   :  { %4199 = shalt.err (!%p4196_p0)
}
 0x5e5   :  { %3481 = dma.vmem_to_hbm [thread:$0]  %s3479_s17, 64, %s5757_s11, [#allocation4]  }
 0x5e6   :  { %4212 = dma.done.wait [#allocation4], 64  }
 0x5e7   :  { %4213 = vsyncadd [#allocation4], 4294967232 }
 0x5e8   :  { %3485 = vsyncpa [#allocation3], 1 }
 0x5e9   :  { %3486 = vsyncpa [#allocation6], 1 }
 0x5ea   :  { %3487 = vsyncpa [#allocation4], 1 }

</bundles_post_ra>
